<compile_context>
chip_gen: v6e
topology: v6e:2x2x1
jax: 0.10.0
libtpu: 0.0.40
codegen_flags: <defaults>
</compile_context>

<pallas_src>
import jax
import jax.numpy as jnp
from jax import lax
from jax.experimental import pallas as pl
from jax.experimental.pallas import tpu as pltpu


def _transition_up_kernel(x_ref, halo_ref, skip_ref, wt_ref, wb_ref, o_ref):
    # x_ref:    (1, TH, W, C)         rows [r*TH, (r+1)*TH) of the input (native dtype)
    # halo_ref: (1, 1, W, C)          input row (r+1)*TH (clamped; masked on last block)
    # skip_ref: (1, TH, 2, W, 2*Cs)   skip rows 2*r*TH .. 2*(r+1)*TH, parity split out
    # wt_ref:   (2C, 4*Cout)          taps for [x | x_di]      -> lanes [y00|y01|y10|y11]
    # wb_ref:   (2C, 4*Cout)          taps for [x_dj | x_didj] -> lanes [y00|y01|y10|y11]
    # o_ref:    (1, TH, 2, W, 2*Ct)   final layout (row parity dim, [pw0 ch | pw1 ch] lanes)
    _, TH, W, C = x_ref.shape
    Cout = wt_ref.shape[1] // 4
    Cskip = skip_ref.shape[-1] // 2
    x = x_ref[0]                                             # (TH, W, C)

    # Bottom halo row: zero past the image edge (last row block).
    keep = (pl.program_id(1) != pl.num_programs(1) - 1).astype(x.dtype)
    halo = halo_ref[0] * keep                                # (1, W, C)

    # x_di[i, j] = x[i + 1, j]   (halo row supplies i == TH - 1)
    if TH > 1:
        x_di = jnp.concatenate([x[1:], halo], axis=0)        # (TH, W, C)
    else:
        x_di = halo

    # ab = [x | x_di]; a single column shift yields [x_dj | x_didj] (zero past right edge).
    ab = jnp.concatenate([x, x_di], axis=-1)                 # (TH, W, 2C)
    zcol = jnp.zeros((TH, 1, 2 * C), ab.dtype)
    ab_dj = jnp.concatenate([ab[:, 1:, :], zcol], axis=1)    # (TH, W, 2C)

    # Two accumulating MXU matmuls (f32 accumulation); lanes = [y00 | y01 | y10 | y11].
    M = TH * W
    y = jnp.dot(ab.reshape(M, 2 * C), wt_ref[...],
                preferred_element_type=jnp.float32)
    y = y + jnp.dot(ab_dj.reshape(M, 2 * C), wb_ref[...],
                    preferred_element_type=jnp.float32)      # (M, 4*Cout) f32
    y3 = y.reshape(TH, W, 4 * Cout)                          # W % 8 == 0: sublane regroup

    # Fused store: for each output-row parity ph, lane-concat
    # [conv(pw=0) | skip(pw=0) | conv(pw=1) | skip(pw=1)] and issue one dense store.
    odt = o_ref.dtype
    for ph in range(2):                                      # static unroll
        conv0 = y3[:, :, (2 * ph) * Cout:(2 * ph + 1) * Cout].astype(odt)
        conv1 = y3[:, :, (2 * ph + 1) * Cout:(2 * ph + 2) * Cout].astype(odt)
        s = skip_ref[0, :, ph]                               # (TH, W, 2*Cskip)
        o_ref[0, :, ph] = jnp.concatenate(
            [conv0, s[:, :, :Cskip].astype(odt),
             conv1, s[:, :, Cskip:].astype(odt)], axis=-1)   # (TH, W, 2*(Cout+Cskip))


def _pack_weight(weight):
    """PyTorch ConvTranspose2d weight (C_in, C_out, 3, 3) -> two (2C, 4*Cout) halves.

    ConvTranspose2d(k=3, s=2, p=1, output_padding=1):
      y00 = x W11
      y01 = x W12 + x_dj W10
      y10 = x W21 + x_di W01
      y11 = x W22 + x_di W02 + x_dj W20 + x_didj W00
    Row blocks of `top` match [x, x_di]; of `bot` match [x_dj, x_didj].
    Column blocks are the output phases [y00, y01, y10, y11]; unused taps are zero.
    """
    C, Cout = weight.shape[0], weight.shape[1]
    Wm = jnp.transpose(weight, (2, 3, 0, 1))                 # (3, 3, C_in, C_out)
    Z = jnp.zeros((C, Cout), weight.dtype)
    top = jnp.concatenate([
        jnp.concatenate([Wm[1, 1], Wm[1, 2], Wm[2, 1], Wm[2, 2]], axis=1),  # x
        jnp.concatenate([Z,        Z,        Wm[0, 1], Wm[0, 2]], axis=1),  # x_di
    ], axis=0)
    bot = jnp.concatenate([
        jnp.concatenate([Z,        Wm[1, 0], Z,        Wm[2, 0]], axis=1),  # x_dj
        jnp.concatenate([Z,        Z,        Z,        Wm[0, 0]], axis=1),  # x_didj
    ], axis=0)
    return top, bot                                          # (2C, 4*Cout) each


def _vmem_capacity_bytes():
    """Per-core VMEM capacity; conservative 64 MiB (v7x) fallback."""
    try:
        info = pltpu.get_tpu_info()
        for name in ("vmem_capacity_bytes", "vmem_bytes", "vmem_size_bytes"):
            v = getattr(info, name, None)
            if v:
                return int(v)
    except Exception:
        pass
    return 64 << 20


def _pick_row_tile(N, H, W, C, Cout, Cskip, itemsize, budget_bytes):
    """Largest row tile TH dividing H whose live buffers fit the VMEM budget."""
    Ct = Cout + Cskip
    per_row = W * (
        itemsize * (4 * C            # x block, double buffered
                    + 8 * Cskip      # skip block (2 parities x 2*Cskip lanes), dbl buffered
                    + 8 * Ct         # out block  (2 parities x 2*Ct lanes),   dbl buffered
                    + 4 * C)         # ab + ab_dj intermediates
        + 16 * Cout                  # f32 matmul accumulator
        + 16 * Ct                    # f32-ish per-parity concat tiles
    )
    cap = max(1, min(H, budget_bytes // max(per_row, 1)))
    if N == 1 and H >= 2:
        cap = min(cap, H // 2)       # >= 2 grid items so both v7x TensorCores get work
    for th in range(cap, 0, -1):
        if H % th == 0:
            return th
    return 1


def transition_up(x_nhwc, skip_nhwc, weight, row_tile=None):
    """x_nhwc: (N, H, W, C); skip_nhwc: (N, 2H, 2W, Cskip);
    weight: PyTorch ConvTranspose2d layout (C_in, C_out, 3, 3).
    Returns (N, 2H, 2W, Cout + Cskip) in NHWC."""
    N, H, W, C = x_nhwc.shape
    Ns, H2, W2, Cskip = skip_nhwc.shape
    assert Ns == N and H2 == 2 * H and W2 == 2 * W, (x_nhwc.shape, skip_nhwc.shape)
    Cout = weight.shape[1]
    Ct = Cout + Cskip
    isz = x_nhwc.dtype.itemsize

    w_top, w_bot = _pack_weight(weight)

    cap = _vmem_capacity_bytes()
    vmem_limit = int(max(32 << 20, min(int(0.7 * cap), 100 << 20)))
    TH = row_tile if row_tile is not None else _pick_row_tile(
        N, H, W, C, Cout, Cskip, isz, int(0.45 * cap))
    assert H % TH == 0, (H, TH)
    R = H // TH

    # Free (bitcast) reshape: expose the skip's row/column parity so the kernel can
    # fuse the channel concat with dense, parity-aligned stores.
    skip_r = skip_nhwc.reshape(N, H, 2, W, 2 * Cskip)

    def x_map(n, r):
        return (n, r, 0, 0)

    def halo_map(n, r):
        # Row (r+1)*TH; clamp for the last block (masked to zero in-kernel anyway).
        return (n, jnp.minimum((r + 1) * TH, H - 1), 0, 0)

    def skip_map(n, r):
        return (n, r, 0, 0, 0)

    def w_map(n, r):
        return (0, 0)                                        # resident: fetched once

    def o_map(n, r):
        return (n, r, 0, 0, 0)

    cost = pl.CostEstimate(
        flops=32 * N * H * W * C * Cout,
        transcendentals=0,
        bytes_accessed=(N * H * W * C * isz
                        + N * 2 * H * 2 * W * Cskip * skip_nhwc.dtype.itemsize
                        + (w_top.size + w_bot.size) * w_top.dtype.itemsize
                        + N * 2 * H * 2 * W * Ct * isz))

    out_r = pl.pallas_call(
        _transition_up_kernel,
        out_shape=jax.ShapeDtypeStruct((N, H, 2, W, 2 * Ct), x_nhwc.dtype),
        grid=(N, R),
        in_specs=[
            pl.BlockSpec((1, TH, W, C), x_map),
            pl.BlockSpec((1, 1, W, C), halo_map),
            pl.BlockSpec((1, TH, 2, W, 2 * Cskip), skip_map),
            pl.BlockSpec((2 * C, 4 * Cout), w_map),
            pl.BlockSpec((2 * C, 4 * Cout), w_map),
        ],
        out_specs=pl.BlockSpec((1, TH, 2, W, 2 * Ct), o_map),
        compiler_params=pltpu.CompilerParams(
            dimension_semantics=("parallel", "parallel"),
            vmem_limit_bytes=vmem_limit),
        cost_estimate=cost,
    )(x_nhwc, x_nhwc, skip_r, w_top, w_bot)

    # Free (bitcast) reshape to NHWC: (N, H, 2, W, 2*Ct) -> (N, 2H, 2W, Ct).
    return out_r.reshape(N, 2 * H, 2 * W, Ct)


def _reference_nchw(x_nchw, skip_nchw, weight):
    # ConvTranspose2d == conv with lhs_dilation=stride, flipped/transposed kernel,
    # padding = (k-1-p, k-1-p+output_padding) = (1, 2) per spatial dim.
    w_conv = jnp.transpose(weight, (1, 0, 2, 3))[:, :, ::-1, ::-1]   # (O, I, 3, 3)
    conv = lax.conv_general_dilated(
        x_nchw, w_conv,
        window_strides=(1, 1),
        padding=[(1, 2), (1, 2)],
        lhs_dilation=(2, 2),
        rhs_dilation=(1, 1),
        dimension_numbers=("NCHW", "OIHW", "NCHW"))
    return jnp.concatenate([conv, skip_nchw], axis=1)


if __name__ == "__main__":
    N, C, H, W = 2, 4, 16, 16
    key = jax.random.PRNGKey(0)
    kx, ks, kw = jax.random.split(key, 3)

    # Module-consistent (PyTorch NCHW) inputs / params, built deterministically.
    x_nchw = jax.random.normal(kx, (N, C, H, W), dtype=jnp.float32)
    skip_nchw = jax.random.normal(ks, (N, C, 2 * H, 2 * W), dtype=jnp.float32)
    weight = jax.random.normal(kw, (C, C, 3, 3), dtype=jnp.float32) * 0.1  # (C_in, C_out, 3, 3)

    # Kernel works in NHWC (layout conversion is test-harness glue, not part of the op).
    x_nhwc = jnp.transpose(x_nchw, (0, 2, 3, 1))
    skip_nhwc = jnp.transpose(skip_nchw, (0, 2, 3, 1))
    ref = _reference_nchw(x_nchw, skip_nchw, weight)

    # 1) auto-picked row tile.
    out_nhwc = jax.block_until_ready(transition_up(x_nhwc, skip_nhwc, weight))
    out_nchw = jnp.transpose(out_nhwc, (0, 3, 1, 2))                  # (N, 2C, 2H, 2W)
    assert out_nchw.shape == (N, 2 * C, 2 * H, 2 * W), out_nchw.shape
    assert jnp.allclose(out_nchw, ref, atol=1e-4, rtol=1e-4), "mismatch vs reference (auto tile)"

    # 2) forced small row tile to exercise the row-tiled grid + halo path.
    out_nhwc_t = jax.block_until_ready(
        transition_up(x_nhwc, skip_nhwc, weight, row_tile=4))
    out_nchw_t = jnp.transpose(out_nhwc_t, (0, 3, 1, 2))
    assert jnp.allclose(out_nchw_t, ref, atol=1e-4, rtol=1e-4), "mismatch vs reference (row_tile=4)"

    print("KERNEL_OK")
</pallas_src>

<mosaic_0001>
module attributes {stable_mosaic.version = 11 : i64} {
  func.func @_transition_up_kernel(%arg0: i32, %arg1: i32, %arg2: memref<1x16x16x4xf32, #tpu.memory_space<vmem>>, %arg3: memref<1x1x16x4xf32, #tpu.memory_space<vmem>>, %arg4: memref<1x16x2x16x8xf32, #tpu.memory_space<vmem>>, %arg5: memref<8x16xf32, #tpu.memory_space<vmem>>, %arg6: memref<8x16xf32, #tpu.memory_space<vmem>>, %arg7: memref<1x16x2x16x16xf32, #tpu.memory_space<vmem>>) attributes {dimension_semantics = [#tpu.dimension_semantics<parallel>, #tpu.dimension_semantics<parallel>], iteration_bounds = array<i64: 2, 1>, scalar_prefetch = 0 : i64, scratch_operands = 0 : i64, tpu.core_type = #tpu.core_type<tc>, window_params = [{transform_indices = @transform_0, window_bounds = array<i64: 1, 16, 16, 4>}, {transform_indices = @transform_1, window_bounds = array<i64: 1, 1, 16, 4>}, {transform_indices = @transform_2, window_bounds = array<i64: 1, 16, 2, 16, 8>}, {pipeline_mode = #tpu.pipeline_mode<synchronous>, transform_indices = @transform_3, window_bounds = array<i64: 8, 16>}, {pipeline_mode = #tpu.pipeline_mode<synchronous>, transform_indices = @transform_4, window_bounds = array<i64: 8, 16>}, {transform_indices = @transform_5, window_bounds = array<i64: 1, 16, 2, 16, 16>}]} {
    %c0 = arith.constant 0 : index
    %c0_0 = arith.constant 0 : index
    %c0_1 = arith.constant 0 : index
    %c0_2 = arith.constant 0 : index
    %0 = vector.load %arg2[%c0, %c0_0, %c0_1, %c0_2] : memref<1x16x16x4xf32, #tpu.memory_space<vmem>>, vector<1x16x16x4xf32>
    %1 = vector.shape_cast %0 : vector<1x16x16x4xf32> to vector<16x16x4xf32>
    %c0_i32 = arith.constant 0 : i32
    %2 = arith.cmpi ne, %arg1, %c0_i32 : i32
    %3 = arith.extui %2 : i1 to i32
    %4 = arith.sitofp %3 : i32 to f32
    %c0_3 = arith.constant 0 : index
    %c0_4 = arith.constant 0 : index
    %c0_5 = arith.constant 0 : index
    %c0_6 = arith.constant 0 : index
    %5 = vector.load %arg3[%c0_3, %c0_4, %c0_5, %c0_6] : memref<1x1x16x4xf32, #tpu.memory_space<vmem>>, vector<1x1x16x4xf32>
    %6 = vector.shape_cast %5 : vector<1x1x16x4xf32> to vector<1x16x4xf32>
    %7 = vector.broadcast %4 : f32 to vector<1x16x4xf32>
    %8 = arith.mulf %6, %7 : vector<1x16x4xf32>
    %9 = vector.extract_strided_slice %1 {offsets = [1, 0, 0], sizes = [15, 16, 4], strides = [1, 1, 1]} : vector<16x16x4xf32> to vector<15x16x4xf32>
    %10 = tpu.concatenate %9, %8 in 0 : vector<15x16x4xf32>, vector<1x16x4xf32> -> vector<16x16x4xf32>
    %11 = tpu.concatenate %1, %10 in 2 : vector<16x16x4xf32>, vector<16x16x4xf32> -> vector<16x16x8xf32>
    %cst = arith.constant 0.000000e+00 : f32
    %12 = vector.broadcast %cst : f32 to vector<16x1x8xf32>
    %13 = vector.extract_strided_slice %11 {offsets = [0, 1, 0], sizes = [16, 15, 8], strides = [1, 1, 1]} : vector<16x16x8xf32> to vector<16x15x8xf32>
    %14 = tpu.concatenate %13, %12 in 1 : vector<16x15x8xf32>, vector<16x1x8xf32> -> vector<16x16x8xf32>
    %15 = vector.shape_cast %11 : vector<16x16x8xf32> to vector<256x8xf32>
    %c0_7 = arith.constant 0 : index
    %c0_8 = arith.constant 0 : index
    %16 = vector.load %arg5[%c0_7, %c0_8] : memref<8x16xf32, #tpu.memory_space<vmem>>, vector<8x16xf32>
    %cst_9 = arith.constant dense<0.000000e+00> : vector<256x16xf32>
    %17 = tpu.matmul %15, %16, %cst_9 {dimension_numbers = #tpu.dot_dimension_numbers<[1], [0], [0], [1], [0, 0, 1, 1], [], []>} : vector<256x8xf32>, vector<8x16xf32>, vector<256x16xf32> -> vector<256x16xf32>
    %18 = vector.shape_cast %14 : vector<16x16x8xf32> to vector<256x8xf32>
    %c0_10 = arith.constant 0 : index
    %c0_11 = arith.constant 0 : index
    %19 = vector.load %arg6[%c0_10, %c0_11] : memref<8x16xf32, #tpu.memory_space<vmem>>, vector<8x16xf32>
    %cst_12 = arith.constant dense<0.000000e+00> : vector<256x16xf32>
    %20 = tpu.matmul %18, %19, %cst_12 {dimension_numbers = #tpu.dot_dimension_numbers<[1], [0], [0], [1], [0, 0, 1, 1], [], []>} : vector<256x8xf32>, vector<8x16xf32>, vector<256x16xf32> -> vector<256x16xf32>
    %21 = arith.addf %17, %20 : vector<256x16xf32>
    %22 = vector.shape_cast %21 : vector<256x16xf32> to vector<16x16x16xf32>
    %23 = vector.extract_strided_slice %22 {offsets = [0, 0, 0], sizes = [16, 16, 4], strides = [1, 1, 1]} : vector<16x16x16xf32> to vector<16x16x4xf32>
    %24 = vector.extract_strided_slice %22 {offsets = [0, 0, 4], sizes = [16, 16, 4], strides = [1, 1, 1]} : vector<16x16x16xf32> to vector<16x16x4xf32>
    %c0_13 = arith.constant 0 : index
    %c0_14 = arith.constant 0 : index
    %c0_15 = arith.constant 0 : index
    %c0_16 = arith.constant 0 : index
    %c0_17 = arith.constant 0 : index
    %25 = vector.load %arg4[%c0_13, %c0_14, %c0_15, %c0_16, %c0_17] : memref<1x16x2x16x8xf32, #tpu.memory_space<vmem>>, vector<1x16x1x16x8xf32>
    %26 = vector.shape_cast %25 : vector<1x16x1x16x8xf32> to vector<16x16x8xf32>
    %27 = vector.extract_strided_slice %26 {offsets = [0, 0, 0], sizes = [16, 16, 4], strides = [1, 1, 1]} : vector<16x16x8xf32> to vector<16x16x4xf32>
    %28 = vector.extract_strided_slice %26 {offsets = [0, 0, 4], sizes = [16, 16, 4], strides = [1, 1, 1]} : vector<16x16x8xf32> to vector<16x16x4xf32>
    %29 = tpu.concatenate %23, %27, %24, %28 in 2 : vector<16x16x4xf32>, vector<16x16x4xf32>, vector<16x16x4xf32>, vector<16x16x4xf32> -> vector<16x16x16xf32>
    %c0_18 = arith.constant 0 : index
    %c0_19 = arith.constant 0 : index
    %c0_20 = arith.constant 0 : index
    %c0_21 = arith.constant 0 : index
    %c0_22 = arith.constant 0 : index
    %30 = vector.load %arg7[%c0_18, %c0_19, %c0_20, %c0_21, %c0_22] : memref<1x16x2x16x16xf32, #tpu.memory_space<vmem>>, vector<1x16x1x16x16xf32>
    %31 = vector.shape_cast %30 : vector<1x16x1x16x16xf32> to vector<16x16x16xf32>
    %32 = vector.shape_cast %29 : vector<16x16x16xf32> to vector<1x16x1x16x16xf32>
    tpu.vector_store %arg7[%c0_18, %c0_19, %c0_20, %c0_21, %c0_22], %32 {strides = array<i32>} : memref<1x16x2x16x16xf32, #tpu.memory_space<vmem>>, vector<1x16x1x16x16xf32>,
    %33 = vector.extract_strided_slice %22 {offsets = [0, 0, 8], sizes = [16, 16, 4], strides = [1, 1, 1]} : vector<16x16x16xf32> to vector<16x16x4xf32>
    %34 = vector.extract_strided_slice %22 {offsets = [0, 0, 12], sizes = [16, 16, 4], strides = [1, 1, 1]} : vector<16x16x16xf32> to vector<16x16x4xf32>
    %c0_23 = arith.constant 0 : index
    %c0_24 = arith.constant 0 : index
    %c1 = arith.constant 1 : index
    %c0_25 = arith.constant 0 : index
    %c0_26 = arith.constant 0 : index
    %35 = vector.load %arg4[%c0_23, %c0_24, %c1, %c0_25, %c0_26] : memref<1x16x2x16x8xf32, #tpu.memory_space<vmem>>, vector<1x16x1x16x8xf32>
    %36 = vector.shape_cast %35 : vector<1x16x1x16x8xf32> to vector<16x16x8xf32>
    %37 = vector.extract_strided_slice %36 {offsets = [0, 0, 0], sizes = [16, 16, 4], strides = [1, 1, 1]} : vector<16x16x8xf32> to vector<16x16x4xf32>
    %38 = vector.extract_strided_slice %36 {offsets = [0, 0, 4], sizes = [16, 16, 4], strides = [1, 1, 1]} : vector<16x16x8xf32> to vector<16x16x4xf32>
    %39 = tpu.concatenate %33, %37, %34, %38 in 2 : vector<16x16x4xf32>, vector<16x16x4xf32>, vector<16x16x4xf32>, vector<16x16x4xf32> -> vector<16x16x16xf32>
    %c0_27 = arith.constant 0 : index
    %c0_28 = arith.constant 0 : index
    %c1_29 = arith.constant 1 : index
    %c0_30 = arith.constant 0 : index
    %c0_31 = arith.constant 0 : index
    %40 = vector.load %arg7[%c0_27, %c0_28, %c1_29, %c0_30, %c0_31] : memref<1x16x2x16x16xf32, #tpu.memory_space<vmem>>, vector<1x16x1x16x16xf32>
    %41 = vector.shape_cast %40 : vector<1x16x1x16x16xf32> to vector<16x16x16xf32>
    %42 = vector.shape_cast %39 : vector<16x16x16xf32> to vector<1x16x1x16x16xf32>
    tpu.vector_store %arg7[%c0_27, %c0_28, %c1_29, %c0_30, %c0_31], %42 {strides = array<i32>} : memref<1x16x2x16x16xf32, #tpu.memory_space<vmem>>, vector<1x16x1x16x16xf32>,
    return
  }
  func.func @transform_0(%arg0: i32, %arg1: i32) -> (i32, i32, i32, i32) {
    %c0_i32 = arith.constant 0 : i32
    %c0_i32_0 = arith.constant 0 : i32
    %c0_i32_1 = arith.constant 0 : i32
    return %arg0, %arg1, %c0_i32, %c0_i32_0 : i32, i32, i32, i32
  }
  func.func @transform_1(%arg0: i32, %arg1: i32) -> (i32, i32, i32, i32) {
    %c1_i32 = arith.constant 1 : i32
    %0 = arith.addi %arg1, %c1_i32 : i32
    %c16_i32 = arith.constant 16 : i32
    %1 = arith.muli %0, %c16_i32 : i32
    %c15_i32 = arith.constant 15 : i32
    %2 = arith.minsi %1, %c15_i32 : i32
    %c0_i32 = arith.constant 0 : i32
    %c0_i32_0 = arith.constant 0 : i32
    %c0_i32_1 = arith.constant 0 : i32
    return %arg0, %2, %c0_i32, %c0_i32_0 : i32, i32, i32, i32
  }
  func.func @transform_2(%arg0: i32, %arg1: i32) -> (i32, i32, i32, i32, i32) {
    %c0_i32 = arith.constant 0 : i32
    %c0_i32_0 = arith.constant 0 : i32
    %c0_i32_1 = arith.constant 0 : i32
    %c0_i32_2 = arith.constant 0 : i32
    return %arg0, %arg1, %c0_i32, %c0_i32_0, %c0_i32_1 : i32, i32, i32, i32, i32
  }
  func.func @transform_3(%arg0: i32, %arg1: i32) -> (i32, i32) {
    %c0_i32 = arith.constant 0 : i32
    %c0_i32_0 = arith.constant 0 : i32
    %c0_i32_1 = arith.constant 0 : i32
    return %c0_i32, %c0_i32_0 : i32, i32
  }
  func.func @transform_4(%arg0: i32, %arg1: i32) -> (i32, i32) {
    %c0_i32 = arith.constant 0 : i32
    %c0_i32_0 = arith.constant 0 : i32
    %c0_i32_1 = arith.constant 0 : i32
    return %c0_i32, %c0_i32_0 : i32, i32
  }
  func.func @transform_5(%arg0: i32, %arg1: i32) -> (i32, i32, i32, i32, i32) {
    %c0_i32 = arith.constant 0 : i32
    %c0_i32_0 = arith.constant 0 : i32
    %c0_i32_1 = arith.constant 0 : i32
    %c0_i32_2 = arith.constant 0 : i32
    return %arg0, %arg1, %c0_i32, %c0_i32_0, %c0_i32_1 : i32, i32, i32, i32, i32
  }
}

</mosaic_0001>

<bundles_post_ra>
// kernel: tpu_custom_call.1
= control target key start
LH: loop header
LB: loop body
LE: loop exit
PB: predicated region body
PF: predicated region fallthrough
CT: control target
= control target key end

     0   :  { %10 = vsyncpa [#allocation3], 0  ;;  %s4966_s0 = inlined_call_operand.vmem [shape: f32[2,16,16,4], index: 0, kind: input, shape index: {}]   ;;  %s4967_s1 = inlined_call_operand.vmem [shape: f32[2,16,16,4], index: 1, kind: input, shape index: {}]   ;;  %s4968_s2 = inlined_call_operand.vmem [shape: f32[2,16,2,16,8], index: 2, kind: input, shape index: {}]   ;;  %s4969_s3 = inlined_call_operand.vmem [shape: f32[8,16], index: 3, kind: input, shape index: {}]   ;;  %s4970_s4 = inlined_call_operand.vmem [shape: f32[8,16], index: 4, kind: input, shape index: {}]   ;;  %s4971_s5 = inlined_call_operand.hbm [shape: f32[2,16,2,16,16], index: 5, kind: output, shape index: {}]  }
   0x1   :  { %12 = vsyncpa [#allocation3 + $0x1], 0  ;;  %s2993_s18 = smov 0   ;;  %s2995_s19 = smov 0  }
   0x2   :  { %s2997_s20 = smov 0   ;;  %s2999_s21 = smov 0  }
   0x3   :  { %s3001_s22 = smov 0   ;;  %s3003_s23 = smov 0  }
   0x4 LB: > { %s2502_s24 = sadd.s32 4294967295, %s2955_s23   ;;  %s2503_s25 = sadd.s32 4294967294, %s2955_s23   ;;  %s2955_s23 = sphi %s3003_s23, %s18_s23   ;;  %s2951_s22 = sphi %s3001_s22, %s5272_s22   ;;  %s2947_s21 = sphi %s2999_s21, %s5271_s21   ;;  %s2943_s20 = sphi %s2997_s20, %s5270_s20   ;;  %s2939_s19 = sphi %s2995_s19, %s5269_s19   ;;  %s2935_s18 = sphi %s2993_s18, %s5268_s18  }
   0x5   : > { %s30_s26 = sadd.s32 1, %s2951_s22  ;;  %s173_s27 = sadd.s32 1, %s2943_s20 }
   0x6   : > { %p32_p0 = scmp.ge.s32.totalorder %s30_s26, 2  ;;  %p183_p1 = scmp.ne.s32.totalorder %s2943_s20, %s2939_s19 }
   0x7   : > { %p184_p2 = scmp.eq.s32.totalorder %s2502_s24, 1  ;;  %p189_p3 = scmp.ne.s32.totalorder %s2939_s19, %s2935_s18 }
   0x8   : > { %s5274_s26 = smov (%p32_p0, %s30_s26), 0  ;;  %p190_p5 = scmp.eq.s32.totalorder %s2503_s25, 1 }
   0x9   : > { %p3033_p4 = por %p184_p2, %p183_p1  ;;  %s168_s29 = ssub.s32 %s2951_s22, %s5274_s26 }
   0xa   : > { %p2506_p6 = scmp.ge.s32.totalorder %s2955_s23, 1  ;;  %p171_p7 = scmp.eq.s32.totalorder %s168_s29, 0 }
   0xb   : > { %p3040_p8 = por %p190_p5, %p189_p3  ;;  %p262_p9 = scmp.lt.s32.totalorder %s2955_s23, 3 }
   0xc   : > { %s3046_s6 = scalar_select %p171_p7, %s2943_s20, %s173_s27  }
   0xd   : > { %p263_p10 = pnand %p2506_p6, %p262_p9 }
   0xf   : > { %266 = sbr.rel (%p263_p10) target bundleno = 730 (0x2da), region = 40 }
  0x14   : > { %p319_p11 = scmp.lt.s32.totalorder %s2947_s21, 1  ;;  %v672_v0 = vld [vmem:[%s4969_s3] sm:$0xff]  ;;  %s2957_s16 = smov 4   ;;  %vm526_vm0 = vcmask 31744   ;;  %vm674_vm1 = vcmask 64512   ;;  %vm591_vm2 = vcmask 1046528  }
  0x15   : > { %v673_v1 = vld [vmem:[%s4970_s4] sm:$0xff]  ;;  %2769 = vmatprep.subr.mxu1 %v672_v0  ;;  %s2958_s10 = smov 8   ;;  %s315_s13 = sand.u32 1, %s2939_s19   ;;  %vm1717_vm3 = vcmask 97280   ;;  %vm1750_vm4 = vcmask 130048  }
  0x16   : > { %2719 = vmatprep.subr.mxu0 %v673_v1  ;;  %s3056_s11 = scalar_select %p319_p11, %s2947_s21, 1  ;;  %2770 = vmatpush3.msra.mxu1 %v672_v0 }
  0x17   : > { %2720 = vmatpush3.msra.mxu0 %v673_v1  ;;  %s2507_s14 = sshll.u32 %s315_s13, 9  ;;  %s2961_s7 = smov [#allocation2]  }
  0x18   : > { %s2647_s12 = sshll.u32 %s3056_s11, 8  ;;  %s2650_s29 = sshll.u32 %s3056_s11, 9 }
  0x19   : > { %s3064_s15 = scalar_lea.vmem %s4966_s0, %s2647_s12  ;;  %s2649_s17 = sadd.s32 240, %s2647_s12 }
  0x1a   : > { %v3067_v2 = vld [vmem:[%s3064_s15 + $0x10] sm:$0xff]  ;;  %v3070_v3 = vld [vmem:[%s3064_s15 + $0x20] sm:$0xff]  ;;  %v3077_v4 = vld [vmem:[%s3064_s15 + $0x18] sm:$0xff]  ;;  %s341_s27 = scalar_lea.vmem %s4967_s1, %s2649_s17  ;;  %s3225_s9 = scalar_lea.vmem %s4968_s2, %s2650_s29 }
  0x1b   : > { %430 = vrot.lane.b32.xlu0 %v3067_v2, %s2957_s16  ;;  %434 = vrot.lane.b32.xlu1 %v3070_v3, %s2957_s16  ;;  %v3080_v5 = vld [vmem:[%s3064_s15 + $0x28] sm:$0xff]  ;;  %v3087_v6 = vld [vmem:[%s3064_s15 + $0x38] sm:$0xff]  ;;  %s2959_s11 = smov 120   ;;  %s2960_s12 = smov 124  }
  0x1c   : > { %v3090_v7 = vld [vmem:[%s3064_s15 + $0x30] sm:$0xff]  ;;  %v3097_v8 = vld [vmem:[%s3064_s15 + $0x48] sm:$0xff]  ;;  %v3100_v9 = vld [vmem:[%s3064_s15 + $0x40] sm:$0xff]  ;;  %s2883_s8 = sshll.u32 %s2961_s7, 4  ;;  %s2884_s8 = int_to_ptr.vmem [resolvable:$false] %s2883_s8 }
  0x1d   : > { %v3107_v10 = vld [vmem:[%s3064_s15 + $0x58] sm:$0xff]  ;;  %v3110_v11 = vld [vmem:[%s3064_s15 + $0x50] sm:$0xff]  ;;  %v3117_v12 = vld [vmem:[%s3064_s15 + $0x68] sm:$0xff] }
  0x1e   : > { %v3120_v13 = vld [vmem:[%s3064_s15 + $0x60] sm:$0xff]  ;;  %v3127_v14 = vld [vmem:[%s3064_s15 + $0x78] sm:$0xff]  ;;  %v3130_v15 = vld [vmem:[%s3064_s15 + $0x70] sm:$0xff] }
  0x1f   : > { %432 = vrot.lane.b32.xlu0 %v3077_v4, %s2957_s16  ;;  %436 = vrot.lane.b32.xlu1 %v3080_v5, %s2957_s16  ;;  %v3137_v16 = vld [vmem:[%s3064_s15 + $0x88] sm:$0xff]  ;;  %v3140_v17 = vld [vmem:[%s3064_s15 + $0x80] sm:$0xff] }
  0x20   : > { %v3147_v18 = vld [vmem:[%s3064_s15 + $0x98] sm:$0xff]  ;;  %v3150_v19 = vld [vmem:[%s3064_s15 + $0x90] sm:$0xff]  ;;  %v3157_v20 = vld [vmem:[%s3064_s15 + $0xa8] sm:$0xff] }
  0x21   : > { %v3160_v21 = vld [vmem:[%s3064_s15 + $0xa0] sm:$0xff]  ;;  %v3167_v22 = vld [vmem:[%s3064_s15 + $0xb8] sm:$0xff]  ;;  %v3170_v23 = vld [vmem:[%s3064_s15 + $0xb0] sm:$0xff] }
  0x22   : > { %v3177_v24 = vld [vmem:[%s3064_s15 + $0xc8] sm:$0xff]  ;;  %v3180_v25 = vld [vmem:[%s3064_s15 + $0xc0] sm:$0xff]  ;;  %v3187_v26 = vld [vmem:[%s3064_s15 + $0xd8] sm:$0xff] }
  0x23   : > { %440 = vrot.lane.b32.xlu1 %v3087_v6, %s2957_s16  ;;  %438 = vrot.lane.b32.xlu0 %v3090_v7, %s2957_s16  ;;  %v3190_v27 = vld [vmem:[%s3064_s15 + $0xd0] sm:$0xff]  ;;  %v3199_v28 = vld [vmem:[%s3064_s15 + $0xe8] sm:$0xff] }
  0x24   : > { %v3202_v29 = vld [vmem:[%s3064_s15 + $0xe0] sm:$0xff]  ;;  %v3212_v30 = vld [vmem:[%s3064_s15 + $0xf8] sm:$0xff]  ;;  %v3215_v31 = vld [vmem:[%s3064_s15 + $0xf0] sm:$0xff] }
  0x25   : > { %5024 = vst [vmem:[#allocation5_spill] sm:$0xff] %v3212_v30  ;;  %5025 = vst [vmem:[#allocation6_spill] sm:$0xff] %v3215_v31  ;;  %v394_v32 = vld [vmem:[%s341_s27 + $0x8] sm:$0xff]  ;;  %v393_v33 = vld [vmem:[%s341_s27] sm:$0xff]  ;;  %s4920_s27 = scalar_lea.sflag [#allocation3], %s315_s13 }
  0x26   : > { %v397_v34 = vmul.f32 0.0, %v394_v32  ;;  %v396_v35 = vmul.f32 0.0, %v393_v33  ;;  %v3230_v36 = vld [vmem:[%s3225_s9 + $0x8] sm:$0xff]  ;;  %v3233_v37 = vld [vmem:[%s3225_s9] sm:$0xff] }
  0x27   : > { %444 = vrot.lane.b32.xlu1 %v3097_v8, %s2957_s16  ;;  %442 = vrot.lane.b32.xlu0 %v3100_v9, %s2957_s16  ;;  %v3240_v38 = vld [vmem:[%s3225_s9 + $0x28] sm:$0xff]  ;;  %v3243_v39 = vld [vmem:[%s3225_s9 + $0x20] sm:$0xff] }
  0x28   : > { %v3250_v40 = vld [vmem:[%s3225_s9 + $0x48] sm:$0xff]  ;;  %v3253_v41 = vld [vmem:[%s3225_s9 + $0x40] sm:$0xff] }
  0x29   : > { %v3260_v42 = vld [vmem:[%s3225_s9 + $0x68] sm:$0xff]  ;;  %v3263_v43 = vld [vmem:[%s3225_s9 + $0x60] sm:$0xff] }
  0x2a   : > { %v3270_v44 = vld [vmem:[%s3225_s9 + $0x88] sm:$0xff]  ;;  %v3273_v45 = vld [vmem:[%s3225_s9 + $0x80] sm:$0xff] }
  0x2b   : > { %448 = vrot.lane.b32.xlu1 %v3107_v10, %s2957_s16  ;;  %446 = vrot.lane.b32.xlu0 %v3110_v11, %s2957_s16  ;;  %v3280_v46 = vld [vmem:[%s3225_s9 + $0xa8] sm:$0xff]  ;;  %v3283_v47 = vld [vmem:[%s3225_s9 + $0xa0] sm:$0xff] }
  0x2c   : > { %v3290_v48 = vld [vmem:[%s3225_s9 + $0xc8] sm:$0xff]  ;;  %v3293_v49 = vld [vmem:[%s3225_s9 + $0xc0] sm:$0xff] }
  0x2d   : > { %v3300_v50 = vld [vmem:[%s3225_s9 + $0xe8] sm:$0xff]  ;;  %v3303_v51 = vld [vmem:[%s3225_s9 + $0xe0] sm:$0xff] }
  0x2e   : > { %v3310_v52 = vld [vmem:[%s3225_s9 + $0x108] sm:$0xff]  ;;  %v3313_v53 = vld [vmem:[%s3225_s9 + $0x100] sm:$0xff] }
  0x2f   : > { %452 = vrot.lane.b32.xlu1 %v3117_v12, %s2957_s16  ;;  %450 = vrot.lane.b32.xlu0 %v3120_v13, %s2957_s16  ;;  %v3320_v54 = vld [vmem:[%s3225_s9 + $0x128] sm:$0xff]  ;;  %v3323_v55 = vld [vmem:[%s3225_s9 + $0x120] sm:$0xff] }
  0x30   : > { %v3330_v56 = vld [vmem:[%s3225_s9 + $0x148] sm:$0xff]  ;;  %v3333_v57 = vld [vmem:[%s3225_s9 + $0x140] sm:$0xff] }
  0x31   : > { %v3340_v58 = vld [vmem:[%s3225_s9 + $0x168] sm:$0xff]  ;;  %v3343_v59 = vld [vmem:[%s3225_s9 + $0x160] sm:$0xff] }
  0x32   : > { %5026 = vst [vmem:[#allocation7_spill] sm:$0xff] %v3343_v59  ;;  %v3350_v60 = vld [vmem:[%s3225_s9 + $0x188] sm:$0xff]  ;;  %v3353_v61 = vld [vmem:[%s3225_s9 + $0x180] sm:$0xff] }
  0x33   : > { %456 = vrot.lane.b32.xlu1 %v3127_v14, %s2957_s16  ;;  %454 = vrot.lane.b32.xlu0 %v3130_v15, %s2957_s16  ;;  %5027 = vst [vmem:[#allocation8_spill] sm:$0xff] %v3350_v60  ;;  %5028 = vst [vmem:[#allocation9_spill] sm:$0xff] %v3353_v61  ;;  %v358_v62 = vld [vmem:[%s3064_s15] sm:$0xff]  ;;  %v3361_v63 = vld [vmem:[%s3225_s9 + $0x1a8] sm:$0xff] }
  0x34   : > { %5029 = vst [vmem:[#allocation10_spill] sm:$0xff] %v3361_v63  ;;  %v3364_v32 = vld [vmem:[%s3225_s9 + $0x1a0] sm:$0xff] }
  0x35   : > { %5030 = vst [vmem:[#allocation11_spill] sm:$0xff] %v3364_v32 }
  0x37   : > { %460 = vrot.lane.b32.xlu1 %v3137_v16, %s2957_s16  ;;  %458 = vrot.lane.b32.xlu0 %v3140_v17, %s2957_s16 }
  0x3b   : > { %464 = vrot.lane.b32.xlu1 %v3147_v18, %s2957_s16  ;;  %462 = vrot.lane.b32.xlu0 %v3150_v19, %s2957_s16 }
  0x3f   : > { %468 = vrot.lane.b32.xlu1 %v3157_v20, %s2957_s16  ;;  %466 = vrot.lane.b32.xlu0 %v3160_v21, %s2957_s16 }
  0x43   : > { %472 = vrot.lane.b32.xlu1 %v3167_v22, %s2957_s16  ;;  %470 = vrot.lane.b32.xlu0 %v3170_v23, %s2957_s16 }
  0x47   : > { %476 = vrot.lane.b32.xlu1 %v3177_v24, %s2957_s16  ;;  %474 = vrot.lane.b32.xlu0 %v3180_v25, %s2957_s16 }
  0x4b   : > { %480 = vrot.lane.b32.xlu1 %v3187_v26, %s2957_s16  ;;  %478 = vrot.lane.b32.xlu0 %v3190_v27, %s2957_s16 }
  0x4f   : > { %484 = vrot.lane.b32.xlu1 %v3199_v28, %s2957_s16  ;;  %482 = vrot.lane.b32.xlu0 %v3202_v29, %s2957_s16 }
  0x53   : > { %488 = vrot.lane.b32.xlu1 %v3212_v30, %s2957_s16  ;;  %486 = vrot.lane.b32.xlu0 %v3215_v31, %s2957_s16 }
  0x57   : > { %492 = vrot.lane.b32.xlu1 %v397_v34, %s2957_s16  ;;  %490 = vrot.lane.b32.xlu0 %v396_v35, %s2957_s16  ;;  %v359_v35 = vld [vmem:[%s3064_s15 + $0x8] sm:$0xff]  ;;  %s4155_s15 = scalar_lea.vmem [#allocation2], %s2507_s14 }
  0x58   : > { %s2378_s17 = sshll.u32 %s4155_s15, 4  ;;  %s4913_s17 = int_to_ptr.vmem [resolvable:$true] %s2378_s17 }
  0x59   : > { %s2879_s29 = scalar_lea.vmem %s4913_s17, 8192  ;;  %p2886_p1 = scmp.lt.s32.totalorder %s4913_s17, %s2884_s8 }
  0x5a   : > { %p2880_p12 = scmp.ne.s32.totalorder %s4913_s17, %s2879_s29 }
  0x5b   : > { %1335 = vrot.lane.b32.xlu1 %v3230_v36, %s2957_s16  ;;  %1333 = vrot.lane.b32.xlu0 %v3233_v37, %s2957_s16 }
  0x5c   : > { %p2881_p13 = pnand %p2880_p12, %p3033_p4 }
  0x5e   : > { %p2882_p0 = pneg %p2881_p13 }
  0x5f   : > { %1339 = vrot.lane.b32.xlu1 %v3240_v38, %s2957_s16  ;;  %1337 = vrot.lane.b32.xlu0 %v3243_v39, %s2957_s16 }
  0x63   : > { %1343 = vrot.lane.b32.xlu1 %v3250_v40, %s2957_s16  ;;  %1341 = vrot.lane.b32.xlu0 %v3253_v41, %s2957_s16 }
  0x67   : > { %1347 = vrot.lane.b32.xlu1 %v3260_v42, %s2957_s16  ;;  %1345 = vrot.lane.b32.xlu0 %v3263_v43, %s2957_s16 }
  0x6b   : > { %1351 = vrot.lane.b32.xlu1 %v3270_v44, %s2957_s16  ;;  %1349 = vrot.lane.b32.xlu0 %v3273_v45, %s2957_s16 }
  0x6f   : > { %1355 = vrot.lane.b32.xlu1 %v3280_v46, %s2957_s16  ;;  %1353 = vrot.lane.b32.xlu0 %v3283_v47, %s2957_s16 }
  0x73   : > { %1359 = vrot.lane.b32.xlu1 %v3290_v48, %s2957_s16  ;;  %1357 = vrot.lane.b32.xlu0 %v3293_v49, %s2957_s16 }
  0x77   : > { %1363 = vrot.lane.b32.xlu1 %v3300_v50, %s2957_s16  ;;  %1361 = vrot.lane.b32.xlu0 %v3303_v51, %s2957_s16 }
  0x7b   : > { %1367 = vrot.lane.b32.xlu1 %v3310_v52, %s2957_s16  ;;  %1365 = vrot.lane.b32.xlu0 %v3313_v53, %s2957_s16 }
  0x7f   : > { %1371 = vrot.lane.b32.xlu1 %v3320_v54, %s2957_s16  ;;  %1369 = vrot.lane.b32.xlu0 %v3323_v55, %s2957_s16 }
  0x83   : > { %1375 = vrot.lane.b32.xlu1 %v3330_v56, %s2957_s16  ;;  %1373 = vrot.lane.b32.xlu0 %v3333_v57, %s2957_s16 }
  0x87   : > { %1379 = vrot.lane.b32.xlu1 %v3340_v58, %s2957_s16  ;;  %1377 = vrot.lane.b32.xlu0 %v3343_v59, %s2957_s16  ;;  %v3379_v59 = vld [vmem:[%s3225_s9 + $0x1c0] sm:$0xff] }
  0x8b   : > { %1383 = vrot.lane.b32.xlu1 %v3350_v60, %s2957_s16  ;;  %1381 = vrot.lane.b32.xlu0 %v3353_v61, %s2957_s16  ;;  %v3376_v61 = vld [vmem:[%s3225_s9 + $0x1c8] sm:$0xff] }
  0x8c   : > { %5031 = vst [vmem:[#allocation12_spill] sm:$0xff] %v3376_v61 }
  0x8d   : > { %v431_v0 = vpop.permute.xlu0 %430  ;;  %v435_v1 = vpop.permute.xlu1 %434 }
  0x8e   : > { %v527_v33 = vsel %vm526_vm0, %v358_v62, %v431_v0  ;;  %v529_v34 = vsel %vm526_vm0, %v3067_v2, %v435_v1 }
  0x8f   : > { %2771 = vmatprep.mubr.msk.f32.mxu1 %vm674_vm1, %v527_v33  ;;  %1387 = vrot.lane.b32.xlu1 %v3361_v63, %s2957_s16  ;;  %v595_v60 = vrot.slane %v529_v34, 1  ;;  %v592_v0 = vrot.slane %v527_v33, 1  ;;  %v3402_v63 = vld [vmem:[%s3225_s9 + $0x1e0] sm:$0xff] }
  0x90   : > { %1385 = vrot.lane.b32.xlu0 %v3364_v32, %s2957_s16 }
  0x91   : > { %v433_v31 = vpop.permute.xlu0 %432  ;;  %v437_v30 = vpop.permute.xlu1 %436 }
  0x92   : > { %v528_v62 = vsel %vm526_vm0, %v359_v35, %v433_v31  ;;  %v530_v2 = vsel %vm526_vm0, %v3077_v4, %v437_v30 }
  0x93   : > { %v593_v1 = vrot.slane %v528_v62, 1  ;;  %2772 = vmatmul.mubr.msk.f32.vlgmr.msra.gmra.mxu1 %vm674_vm1, %v528_v62  ;;  %v596_v32 = vrot.slane %v530_v2, 1  ;;  %1391 = vrot.lane.b32.xlu1 %v3376_v61, %s2957_s16 }
  0x94   : > { %2774 = vmatprep.mubr.msk.f32.mxu1 %vm674_vm1, %v529_v34  ;;  %1389 = vrot.lane.b32.xlu0 %v3379_v59, %s2957_s16  ;;  %v3399_v34 = vld [vmem:[%s3225_s9 + $0x1e8] sm:$0xff] }
  0x95   : > { %v594_v31 = vsel %vm591_vm2, %v592_v0, %v593_v1  ;;  %v656_v4 = vsel %vm591_vm2, %v593_v1, 0.0  ;;  %v441_v30 = vpop.permute.xlu1 %440  ;;  %v439_v35 = vpop.permute.xlu0 %438  ;;  %v597_v33 = vsel %vm591_vm2, %v595_v60, %v596_v32  ;;  %v657_v60 = vsel %vm591_vm2, %v596_v32, 0.0 }
  0x96   : > { %2721 = vmatprep.mubr.msk.f32.mxu0 %vm674_vm1, %v594_v31  ;;  %v532_v62 = vsel %vm526_vm0, %v3080_v5, %v441_v30  ;;  %v531_v61 = vsel %vm526_vm0, %v3070_v3, %v439_v35 }
  0x97   : > { %2722 = vmatmul.mubr.msk.f32.vlgmr.msra.gmra.mxu0 %vm674_vm1, %v656_v4  ;;  %v599_v0 = vrot.slane %v532_v62, 1  ;;  %v598_v1 = vrot.slane %v531_v61, 1  ;;  %2775 = vmatmul.mubr.msk.f32.gmra.mxu1 %vm674_vm1, %v530_v2 }
  0x98   : > { %2724 = vmatprep.mubr.msk.f32.mxu0 %vm674_vm1, %v597_v33  ;;  %2777 = vmatprep.mubr.msk.f32.mxu1 %vm674_vm1, %v531_v61 }
  0x99   : > { %v445_v5 = vpop.permute.xlu1 %444  ;;  %v443_v31 = vpop.permute.xlu0 %442  ;;  %v600_v3 = vsel %vm591_vm2, %v598_v1, %v599_v0  ;;  %1395 = vrot.lane.b32.xlu1 %v3399_v34, %s2957_s16  ;;  %1393 = vrot.lane.b32.xlu0 %v3402_v63, %s2957_s16  ;;  %v658_v30 = vsel %vm591_vm2, %v599_v0, 0.0 }
  0x9a   : > { %v534_v4 = vsel %vm526_vm0, %v3087_v6, %v445_v5  ;;  %v533_v2 = vsel %vm526_vm0, %v3090_v7, %v443_v31 }
  0x9b   : > { %2725 = vmatmul.mubr.msk.f32.gmra.mxu0 %vm674_vm1, %v657_v60  ;;  %v602_v32 = vrot.slane %v534_v4, 1  ;;  %v601_v61 = vrot.slane %v533_v2, 1  ;;  %2778 = vmatmul.mubr.msk.f32.gmra.mxu1 %vm674_vm1, %v532_v62 }
  0x9c   : > { %2727 = vmatprep.mubr.msk.f32.mxu0 %vm674_vm1, %v600_v3  ;;  %2780 = vmatprep.mubr.msk.f32.mxu1 %vm674_vm1, %v533_v2 }
  0x9d   : > { %v449_v35 = vpop.permute.xlu1 %448  ;;  %v447_v33 = vpop.permute.xlu0 %446  ;;  %v603_v1 = vsel %vm591_vm2, %v601_v61, %v602_v32  ;;  %1559 = vrot.lane.b32.xlu1 %v3230_v36, %s2958_s10  ;;  %1557 = vrot.lane.b32.xlu0 %v3233_v37, %s2958_s10  ;;  %v659_v60 = vsel %vm591_vm2, %v602_v32, 0.0 }
  0x9e   : > { %v536_v6 = vsel %vm526_vm0, %v3097_v8, %v449_v35  ;;  %v535_v7 = vsel %vm526_vm0, %v3100_v9, %v447_v33 }
  0x9f   : > { %2728 = vmatmul.mubr.msk.f32.gmra.mxu0 %vm674_vm1, %v658_v30  ;;  %v605_v62 = vrot.slane %v536_v6, 1  ;;  %v604_v0 = vrot.slane %v535_v7, 1  ;;  %2781 = vmatmul.mubr.msk.f32.gmra.mxu1 %vm674_vm1, %v534_v4 }
  0xa0   : > { %2730 = vmatprep.mubr.msk.f32.mxu0 %vm674_vm1, %v603_v1  ;;  %2783 = vmatprep.mubr.msk.f32.mxu1 %vm674_vm1, %v535_v7 }
  0xa1   : > { %v453_v36 = vpop.permute.xlu1 %452  ;;  %v451_v37 = vpop.permute.xlu0 %450  ;;  %v606_v5 = vsel %vm591_vm2, %v604_v0, %v605_v62  ;;  %1563 = vrot.lane.b32.xlu1 %v3240_v38, %s2958_s10  ;;  %1561 = vrot.lane.b32.xlu0 %v3243_v39, %s2958_s10  ;;  %v660_v4 = vsel %vm591_vm2, %v605_v62, 0.0 }
  0xa2   : > { %v538_v8 = vsel %vm526_vm0, %v3107_v10, %v453_v36  ;;  %v537_v9 = vsel %vm526_vm0, %v3110_v11, %v451_v37 }
  0xa3   : > { %2731 = vmatmul.mubr.msk.f32.gmra.mxu0 %vm674_vm1, %v659_v60  ;;  %v608_v31 = vrot.slane %v538_v8, 1  ;;  %v607_v3 = vrot.slane %v537_v9, 1  ;;  %2784 = vmatmul.mubr.msk.f32.gmra.mxu1 %vm674_vm1, %v536_v6 }
  0xa4   : > { %2733 = vmatprep.mubr.msk.f32.mxu0 %vm674_vm1, %v606_v5  ;;  %2786 = vmatprep.mubr.msk.f32.mxu1 %vm674_vm1, %v537_v9 }
  0xa5   : > { %v457_v38 = vpop.permute.xlu1 %456  ;;  %v455_v39 = vpop.permute.xlu0 %454  ;;  %v609_v2 = vsel %vm591_vm2, %v607_v3, %v608_v31  ;;  %1567 = vrot.lane.b32.xlu1 %v3250_v40, %s2958_s10  ;;  %1565 = vrot.lane.b32.xlu0 %v3253_v41, %s2958_s10  ;;  %v661_v30 = vsel %vm591_vm2, %v608_v31, 0.0 }
  0xa6   : > { %v540_v10 = vsel %vm526_vm0, %v3117_v12, %v457_v38  ;;  %v539_v11 = vsel %vm526_vm0, %v3120_v13, %v455_v39 }
  0xa7   : > { %2734 = vmatmul.mubr.msk.f32.gmra.mxu0 %vm674_vm1, %v660_v4  ;;  %v611_v32 = vrot.slane %v540_v10, 1  ;;  %v610_v61 = vrot.slane %v539_v11, 1  ;;  %2787 = vmatmul.mubr.msk.f32.gmra.mxu1 %vm674_vm1, %v538_v8 }
  0xa8   : > { %2736 = vmatprep.mubr.msk.f32.mxu0 %vm674_vm1, %v609_v2  ;;  %2789 = vmatprep.mubr.msk.f32.mxu1 %vm674_vm1, %v539_v11 }
  0xa9   : > { %v461_v40 = vpop.permute.xlu1 %460  ;;  %v459_v41 = vpop.permute.xlu0 %458  ;;  %v612_v35 = vsel %vm591_vm2, %v610_v61, %v611_v32  ;;  %1571 = vrot.lane.b32.xlu1 %v3260_v42, %s2958_s10  ;;  %1569 = vrot.lane.b32.xlu0 %v3263_v43, %s2958_s10  ;;  %v662_v6 = vsel %vm591_vm2, %v611_v32, 0.0 }
  0xaa   : > { %v542_v12 = vsel %vm526_vm0, %v3127_v14, %v461_v40  ;;  %v541_v13 = vsel %vm526_vm0, %v3130_v15, %v459_v41 }
  0xab   : > { %2737 = vmatmul.mubr.msk.f32.gmra.mxu0 %vm674_vm1, %v661_v30  ;;  %v614_v33 = vrot.slane %v542_v12, 1  ;;  %v613_v1 = vrot.slane %v541_v13, 1  ;;  %2790 = vmatmul.mubr.msk.f32.gmra.mxu1 %vm674_vm1, %v540_v10 }
  0xac   : > { %2739 = vmatprep.mubr.msk.f32.mxu0 %vm674_vm1, %v612_v35  ;;  %2792 = vmatprep.mubr.msk.f32.mxu1 %vm674_vm1, %v541_v13 }
  0xad   : > { %v465_v42 = vpop.permute.xlu1 %464  ;;  %v463_v43 = vpop.permute.xlu0 %462  ;;  %v615_v7 = vsel %vm591_vm2, %v613_v1, %v614_v33  ;;  %1575 = vrot.lane.b32.xlu1 %v3270_v44, %s2958_s10  ;;  %1573 = vrot.lane.b32.xlu0 %v3273_v45, %s2958_s10  ;;  %v663_v60 = vsel %vm591_vm2, %v614_v33, 0.0 }
  0xae   : > { %v544_v14 = vsel %vm526_vm0, %v3137_v16, %v465_v42  ;;  %v543_v15 = vsel %vm526_vm0, %v3140_v17, %v463_v43 }
  0xaf   : > { %2740 = vmatmul.mubr.msk.f32.gmra.mxu0 %vm674_vm1, %v662_v6  ;;  %v617_v62 = vrot.slane %v544_v14, 1  ;;  %v616_v0 = vrot.slane %v543_v15, 1  ;;  %2793 = vmatmul.mubr.msk.f32.gmra.mxu1 %vm674_vm1, %v542_v12 }
  0xb0   : > { %2742 = vmatprep.mubr.msk.f32.mxu0 %vm674_vm1, %v615_v7  ;;  %2795 = vmatprep.mubr.msk.f32.mxu1 %vm674_vm1, %v543_v15  ;;  %v5034_v7 = vld [vmem:[#allocation6_spill] sm:$0xff] }
  0xb1   : > { %v469_v44 = vpop.permute.xlu1 %468  ;;  %v467_v45 = vpop.permute.xlu0 %466  ;;  %v618_v36 = vsel %vm591_vm2, %v616_v0, %v617_v62  ;;  %1579 = vrot.lane.b32.xlu1 %v3280_v46, %s2958_s10  ;;  %1577 = vrot.lane.b32.xlu0 %v3283_v47, %s2958_s10  ;;  %v664_v8 = vsel %vm591_vm2, %v617_v62, 0.0 }
  0xb2   : > { %v546_v16 = vsel %vm526_vm0, %v3147_v18, %v469_v44  ;;  %v545_v17 = vsel %vm526_vm0, %v3150_v19, %v467_v45  ;;  %v5036_v45 = vld [vmem:[#allocation9_spill] sm:$0xff] }
  0xb3   : > { %2743 = vmatmul.mubr.msk.f32.gmra.mxu0 %vm674_vm1, %v663_v60  ;;  %v620_v37 = vrot.slane %v546_v16, 1  ;;  %v619_v5 = vrot.slane %v545_v17, 1  ;;  %2796 = vmatmul.mubr.msk.f32.gmra.mxu1 %vm674_vm1, %v544_v14  ;;  %v5035_v60 = vld [vmem:[#allocation8_spill] sm:$0xff] }
  0xb4   : > { %2745 = vmatprep.mubr.msk.f32.mxu0 %vm674_vm1, %v618_v36  ;;  %2798 = vmatprep.mubr.msk.f32.mxu1 %vm674_vm1, %v545_v17  ;;  %v5037_v17 = vld [vmem:[#allocation10_spill] sm:$0xff] }
  0xb5   : > { %v473_v46 = vpop.permute.xlu1 %472  ;;  %v471_v47 = vpop.permute.xlu0 %470  ;;  %v621_v9 = vsel %vm591_vm2, %v619_v5, %v620_v37  ;;  %1583 = vrot.lane.b32.xlu1 %v3290_v48, %s2958_s10  ;;  %1581 = vrot.lane.b32.xlu0 %v3293_v49, %s2958_s10  ;;  %v665_v4 = vsel %vm591_vm2, %v620_v37, 0.0  ;;  %v5038_v5 = vld [vmem:[#allocation11_spill] sm:$0xff] }
  0xb6   : > { %v548_v18 = vsel %vm526_vm0, %v3157_v20, %v473_v46  ;;  %v547_v19 = vsel %vm526_vm0, %v3160_v21, %v471_v47  ;;  %v5039_v46 = vld [vmem:[#allocation12_spill] sm:$0xff] }
  0xb7   : > { %2746 = vmatmul.mubr.msk.f32.gmra.mxu0 %vm674_vm1, %v664_v8  ;;  %v623_v31 = vrot.slane %v548_v18, 1  ;;  %v622_v3 = vrot.slane %v547_v19, 1  ;;  %2799 = vmatmul.mubr.msk.f32.gmra.mxu1 %vm674_vm1, %v546_v16 }
  0xb8   : > { %2748 = vmatprep.mubr.msk.f32.mxu0 %vm674_vm1, %v621_v9  ;;  %2801 = vmatprep.mubr.msk.f32.mxu1 %vm674_vm1, %v547_v19 }
  0xb9   : > { %v477_v48 = vpop.permute.xlu1 %476  ;;  %v475_v49 = vpop.permute.xlu0 %474  ;;  %v624_v38 = vsel %vm591_vm2, %v622_v3, %v623_v31  ;;  %1587 = vrot.lane.b32.xlu1 %v3300_v50, %s2958_s10  ;;  %1585 = vrot.lane.b32.xlu0 %v3303_v51, %s2958_s10  ;;  %v666_v10 = vsel %vm591_vm2, %v623_v31, 0.0  ;;  %v3630_v31 = vld [vmem:[%s3225_s9 + $0x18] sm:$0xff]  ;;  %v3633_v3 = vld [vmem:[%s3225_s9 + $0x10] sm:$0xff] }
  0xba   : > { %v550_v20 = vsel %vm526_vm0, %v3167_v22, %v477_v48  ;;  %v549_v21 = vsel %vm526_vm0, %v3170_v23, %v475_v49 }
  0xbb   : > { %2749 = vmatmul.mubr.msk.f32.gmra.mxu0 %vm674_vm1, %v665_v4  ;;  %v626_v39 = vrot.slane %v550_v20, 1  ;;  %v625_v2 = vrot.slane %v549_v21, 1  ;;  %2802 = vmatmul.mubr.msk.f32.gmra.mxu1 %vm674_vm1, %v548_v18  ;;  %v3644_v4 = vld [vmem:[%s3225_s9 + $0x38] sm:$0xff] }
  0xbc   : > { %2751 = vmatprep.mubr.msk.f32.mxu0 %vm674_vm1, %v624_v38  ;;  %2804 = vmatprep.mubr.msk.f32.mxu1 %vm674_vm1, %v549_v21  ;;  %5042 = vst [vmem:[#allocation6_spill] sm:$0xff] %v3644_v4  ;;  %v3658_v38 = vld [vmem:[%s3225_s9 + $0x58] sm:$0xff] }
  0xbd   : > { %v481_v50 = vpop.permute.xlu1 %480  ;;  %v479_v51 = vpop.permute.xlu0 %478  ;;  %v627_v11 = vsel %vm591_vm2, %v625_v2, %v626_v39  ;;  %1591 = vrot.lane.b32.xlu1 %v3310_v52, %s2958_s10  ;;  %1589 = vrot.lane.b32.xlu0 %v3313_v53, %s2958_s10  ;;  %v667_v30 = vsel %vm591_vm2, %v626_v39, 0.0  ;;  %5044 = vst [vmem:[#allocation9_spill] sm:$0xff] %v3658_v38  ;;  %v3672_v2 = vld [vmem:[%s3225_s9 + $0x78] sm:$0xff] }
  0xbe   : > { %v552_v22 = vsel %vm526_vm0, %v3177_v24, %v481_v50  ;;  %v551_v23 = vsel %vm526_vm0, %v3180_v25, %v479_v51  ;;  %5046 = vst [vmem:[#allocation11_spill] sm:$0xff] %v3672_v2 }
  0xbf   : > { %2752 = vmatmul.mubr.msk.f32.gmra.mxu0 %vm674_vm1, %v666_v10  ;;  %v629_v32 = vrot.slane %v552_v22, 1  ;;  %v628_v61 = vrot.slane %v551_v23, 1  ;;  %2805 = vmatmul.mubr.msk.f32.gmra.mxu1 %vm674_vm1, %v550_v20  ;;  %v3661_v20 = vld [vmem:[%s3225_s9 + $0x50] sm:$0xff] }
  0xc0   : > { %2754 = vmatprep.mubr.msk.f32.mxu0 %vm674_vm1, %v627_v11  ;;  %2807 = vmatprep.mubr.msk.f32.mxu1 %vm674_vm1, %v551_v23  ;;  %5045 = vst [vmem:[#allocation10_spill] sm:$0xff] %v3661_v20  ;;  %v3675_v10 = vld [vmem:[%s3225_s9 + $0x70] sm:$0xff]  ;;  %v3686_v11 = vld [vmem:[%s3225_s9 + $0x98] sm:$0xff] }
  0xc1   : > { %v485_v52 = vpop.permute.xlu1 %484  ;;  %v483_v53 = vpop.permute.xlu0 %482  ;;  %v630_v40 = vsel %vm591_vm2, %v628_v61, %v629_v32  ;;  %1595 = vrot.lane.b32.xlu1 %v3320_v54, %s2958_s10  ;;  %1593 = vrot.lane.b32.xlu0 %v3323_v55, %s2958_s10  ;;  %v668_v12 = vsel %vm591_vm2, %v629_v32, 0.0  ;;  %5047 = vst [vmem:[#allocation12_spill] sm:$0xff] %v3675_v10  ;;  %5049 = vst [vmem:[#allocation14_spill] sm:$0xff] %v3686_v11  ;;  %v3700_v61 = vld [vmem:[%s3225_s9 + $0xb8] sm:$0xff] }
  0xc2   : > { %v554_v24 = vsel %vm526_vm0, %v3187_v26, %v485_v52  ;;  %v553_v25 = vsel %vm526_vm0, %v3190_v27, %v483_v53  ;;  %5053 = vst [vmem:[#allocation18_spill] sm:$0xff] %v3700_v61 }
  0xc3   : > { %2755 = vmatmul.mubr.msk.f32.gmra.mxu0 %vm674_vm1, %v667_v30  ;;  %v632_v41 = vrot.slane %v554_v24, 1  ;;  %v631_v35 = vrot.slane %v553_v25, 1  ;;  %2808 = vmatmul.mubr.msk.f32.gmra.mxu1 %vm674_vm1, %v552_v22  ;;  %v3689_v22 = vld [vmem:[%s3225_s9 + $0x90] sm:$0xff] }
  0xc4   : > { %2757 = vmatprep.mubr.msk.f32.mxu0 %vm674_vm1, %v630_v40  ;;  %2810 = vmatprep.mubr.msk.f32.mxu1 %vm674_vm1, %v553_v25  ;;  %5050 = vst [vmem:[#allocation15_spill] sm:$0xff] %v3689_v22  ;;  %v3703_v30 = vld [vmem:[%s3225_s9 + $0xb0] sm:$0xff]  ;;  %v3714_v40 = vld [vmem:[%s3225_s9 + $0xd8] sm:$0xff] }
  0xc5   : > { %v489_v54 = vpop.permute.xlu1 %488  ;;  %v487_v55 = vpop.permute.xlu0 %486  ;;  %v633_v13 = vsel %vm591_vm2, %v631_v35, %v632_v41  ;;  %1599 = vrot.lane.b32.xlu1 %v3330_v56, %s2958_s10  ;;  %1597 = vrot.lane.b32.xlu0 %v3333_v57, %s2958_s10  ;;  %v669_v6 = vsel %vm591_vm2, %v632_v41, 0.0  ;;  %5054 = vst [vmem:[#allocation19_spill] sm:$0xff] %v3703_v30  ;;  %5057 = vst [vmem:[#allocation22_spill] sm:$0xff] %v3714_v40  ;;  %v3728_v35 = vld [vmem:[%s3225_s9 + $0xf8] sm:$0xff] }
  0xc6   : > { %v556_v26 = vsel %vm526_vm0, %v3199_v28, %v489_v54  ;;  %v555_v27 = vsel %vm526_vm0, %v3202_v29, %v487_v55  ;;  %v5032_v28 = vld [vmem:[#allocation7_spill] sm:$0xff]  ;;  %v5033_v29 = vld [vmem:[#allocation5_spill] sm:$0xff]  ;;  %5061 = vst [vmem:[#allocation26_spill] sm:$0xff] %v3728_v35 }
  0xc7   : > { %2758 = vmatmul.mubr.msk.f32.gmra.mxu0 %vm674_vm1, %v668_v12  ;;  %v635_v33 = vrot.slane %v556_v26, 1  ;;  %v634_v1 = vrot.slane %v555_v27, 1  ;;  %2811 = vmatmul.mubr.msk.f32.gmra.mxu1 %vm674_vm1, %v554_v24  ;;  %5040 = vst [vmem:[#allocation7_spill] sm:$0xff] %v3630_v31  ;;  %5041 = vst [vmem:[#allocation5_spill] sm:$0xff] %v3633_v3  ;;  %v3717_v24 = vld [vmem:[%s3225_s9 + $0xd0] sm:$0xff] }
  0xc8   : > { %2760 = vmatprep.mubr.msk.f32.mxu0 %vm674_vm1, %v633_v13  ;;  %2813 = vmatprep.mubr.msk.f32.mxu1 %vm674_vm1, %v555_v27  ;;  %5058 = vst [vmem:[#allocation23_spill] sm:$0xff] %v3717_v24  ;;  %v3731_v12 = vld [vmem:[%s3225_s9 + $0xf0] sm:$0xff]  ;;  %v3742_v13 = vld [vmem:[%s3225_s9 + $0x118] sm:$0xff] }
  0xc9   : > { %v493_v56 = vpop.permute.xlu1 %492  ;;  %v491_v57 = vpop.permute.xlu0 %490  ;;  %v636_v42 = vsel %vm591_vm2, %v634_v1, %v635_v33  ;;  %1603 = vrot.lane.b32.xlu1 %v3340_v58, %s2958_s10  ;;  %1601 = vrot.lane.b32.xlu0 %v5032_v28, %s2958_s10  ;;  %v670_v0 = vsel %vm591_vm2, %v635_v33, 0.0  ;;  %5062 = vst [vmem:[#allocation27_spill] sm:$0xff] %v3731_v12  ;;  %5065 = vst [vmem:[#allocation30_spill] sm:$0xff] %v3742_v13  ;;  %v3756_v1 = vld [vmem:[%s3225_s9 + $0x138] sm:$0xff]  ;;  %v3773_v28 = vld [vmem:[%s3225_s9 + $0x150] sm:$0xff] }
  0xca   : > { %v558_v43 = vsel %vm526_vm0, %v5033_v29, %v493_v56  ;;  %v557_v14 = vsel %vm526_vm0, %v5034_v7, %v491_v57  ;;  %5069 = vst [vmem:[#allocation34_spill] sm:$0xff] %v3756_v1  ;;  %v3768_v57 = vld [vmem:[%s3225_s9 + $0x158] sm:$0xff]  ;;  %5074 = vst [vmem:[#allocation39_spill] sm:$0xff] %v3773_v28 }
  0xcb   : > { %2761 = vmatmul.mubr.msk.f32.gmra.mxu0 %vm674_vm1, %v669_v6  ;;  %v638_v15 = vrot.slane %v558_v43, 1  ;;  %v637_v62 = vrot.slane %v557_v14, 1  ;;  %2814 = vmatmul.mubr.msk.f32.gmra.mxu1 %vm674_vm1, %v556_v26  ;;  %v3745_v26 = vld [vmem:[%s3225_s9 + $0x110] sm:$0xff]  ;;  %5072 = vst [vmem:[#allocation37_spill] sm:$0xff] %v3768_v57 }
  0xcc   : > { %2763 = vmatprep.mubr.msk.f32.mxu0 %vm674_vm1, %v636_v42  ;;  %2816 = vmatprep.mubr.msk.f32.mxu1 %vm674_vm1, %v557_v14  ;;  %5066 = vst [vmem:[#allocation31_spill] sm:$0xff] %v3745_v26  ;;  %v3759_v6 = vld [vmem:[%s3225_s9 + $0x130] sm:$0xff] }
  0xcd   : > { %v639_v58 = vsel %vm591_vm2, %v637_v62, %v638_v15  ;;  %1607 = vrot.lane.b32.xlu1 %v5035_v60, %s2958_s10  ;;  %v3594_v44 = vpop.permute.xlu1 %1335  ;;  %1605 = vrot.lane.b32.xlu0 %v5036_v45, %s2958_s10  ;;  %v3598_v36 = vpop.permute.xlu0 %1333  ;;  %v671_v16 = vsel %vm591_vm2, %v638_v15, 0.0  ;;  %5070 = vst [vmem:[#allocation35_spill] sm:$0xff] %v3759_v6  ;;  %v3787_v14 = vld [vmem:[%s3225_s9 + $0x170] sm:$0xff]  ;;  %v3794_v15 = vld [vmem:[%s3225_s9 + $0x198] sm:$0xff] }
  0xce   : > { %5078 = vst [vmem:[#allocation43_spill] sm:$0xff] %v3787_v14  ;;  %5079 = vst [vmem:[#allocation44_spill] sm:$0xff] %v3794_v15  ;;  %v3797_v62 = vld [vmem:[%s3225_s9 + $0x190] sm:$0xff]  ;;  %v3808_v60 = vld [vmem:[%s3225_s9 + $0x1b8] sm:$0xff] }
  0xcf   : > { %2764 = vmatmul.mubr.msk.f32.gmra.mxu0 %vm674_vm1, %v670_v0  ;;  %2817 = vmatmul.mubr.msk.f32.gmra.mxu1 %vm674_vm1, %v558_v43  ;;  %v3782_v43 = vld [vmem:[%s3225_s9 + $0x178] sm:$0xff]  ;;  %5080 = vst [vmem:[#allocation45_spill] sm:$0xff] %v3797_v62  ;;  %5083 = vst [vmem:[#allocation48_spill] sm:$0xff] %v3808_v60  ;;  %v3811_v45 = vld [vmem:[%s3225_s9 + $0x1b0] sm:$0xff] }
  0xd0   : > { %2766 = vmatprep.mubr.msk.f32.mxu0 %vm674_vm1, %v639_v58  ;;  %5076 = vst [vmem:[#allocation41_spill] sm:$0xff] %v3782_v43  ;;  %5084 = vst [vmem:[#allocation49_spill] sm:$0xff] %v3811_v45 }
  0xd1   : > { %1611 = vrot.lane.b32.xlu1 %v5037_v17, %s2958_s10  ;;  %v3606_v37 = vpop.permute.xlu1 %1339  ;;  %1609 = vrot.lane.b32.xlu0 %v5038_v5, %s2958_s10  ;;  %v3610_v8 = vpop.permute.xlu0 %1337  ;;  %v3822_v5 = vld [vmem:[%s3225_s9 + $0x1d8] sm:$0xff] }
  0xd2   : > { %5085 = vst [vmem:[#allocation50_spill] sm:$0xff] %v3822_v5 }
  0xd3   : > { %2767 = vmatmul.mubr.msk.f32.gmra.mxu0 %vm674_vm1, %v671_v16 }
  0xd5   : > { %1615 = vrot.lane.b32.xlu1 %v5039_v46, %s2958_s10  ;;  %v3615_v47 = vpop.permute.xlu1 %1343  ;;  %1613 = vrot.lane.b32.xlu0 %v3379_v59, %s2958_s10  ;;  %v3619_v9 = vpop.permute.xlu0 %1341  ;;  %v3825_v46 = vld [vmem:[%s3225_s9 + $0x1d0] sm:$0xff] }
  0xd6   : > { %5086 = vst [vmem:[#allocation51_spill] sm:$0xff] %v3825_v46 }
  0xd9   : > { %1619 = vrot.lane.b32.xlu1 %v3399_v34, %s2958_s10  ;;  %v3623_v18 = vpop.permute.xlu1 %1347  ;;  %1617 = vrot.lane.b32.xlu0 %v3402_v63, %s2958_s10  ;;  %v3627_v19 = vpop.permute.xlu0 %1345  ;;  %v3647_v63 = vld [vmem:[%s3225_s9 + $0x30] sm:$0xff] }
  0xda   : > { %5043 = vst [vmem:[#allocation8_spill] sm:$0xff] %v3647_v63 }
  0xdd   : > { %1946 = vrot.lane.b32.xlu1 %v3630_v31, %s2957_s16  ;;  %v3637_v59 = vpop.permute.xlu1 %1351  ;;  %1944 = vrot.lane.b32.xlu0 %v3633_v3, %s2957_s16  ;;  %v3641_v34 = vpop.permute.xlu0 %1349 }
  0xe1   : > { %1950 = vrot.lane.b32.xlu1 %v3644_v4, %s2957_s16  ;;  %v3651_v48 = vpop.permute.xlu1 %1355  ;;  %1948 = vrot.lane.b32.xlu0 %v3647_v63, %s2957_s16  ;;  %v3655_v49 = vpop.permute.xlu0 %1353 }
  0xe5   : > { %1954 = vrot.lane.b32.xlu1 %v3658_v38, %s2957_s16  ;;  %v3665_v21 = vpop.permute.xlu1 %1359  ;;  %1952 = vrot.lane.b32.xlu0 %v3661_v20, %s2957_s16  ;;  %v3669_v39 = vpop.permute.xlu0 %1357 }
  0xe9   : > { %1958 = vrot.lane.b32.xlu1 %v3672_v2, %s2957_s16  ;;  %v3679_v50 = vpop.permute.xlu1 %1363  ;;  %1956 = vrot.lane.b32.xlu0 %v3675_v10, %s2957_s16  ;;  %v3683_v51 = vpop.permute.xlu0 %1361 }
  0xea   : > { %5048 = vst [vmem:[#allocation13_spill] sm:$0xff] %v3683_v51 }
  0xed   : > { %1962 = vrot.lane.b32.xlu1 %v3686_v11, %s2957_s16  ;;  %v3693_v23 = vpop.permute.xlu1 %1367  ;;  %1960 = vrot.lane.b32.xlu0 %v3689_v22, %s2957_s16  ;;  %v3697_v32 = vpop.permute.xlu0 %1365 }
  0xee   : > { %5051 = vst [vmem:[#allocation16_spill] sm:$0xff] %v3693_v23  ;;  %5052 = vst [vmem:[#allocation17_spill] sm:$0xff] %v3697_v32 }
  0xf1   : > { %1966 = vrot.lane.b32.xlu1 %v3700_v61, %s2957_s16  ;;  %v3707_v52 = vpop.permute.xlu1 %1371  ;;  %1964 = vrot.lane.b32.xlu0 %v3703_v30, %s2957_s16  ;;  %v3711_v53 = vpop.permute.xlu0 %1369 }
  0xf2   : > { %5055 = vst [vmem:[#allocation20_spill] sm:$0xff] %v3707_v52  ;;  %5056 = vst [vmem:[#allocation21_spill] sm:$0xff] %v3711_v53 }
  0xf5   : > { %1970 = vrot.lane.b32.xlu1 %v3714_v40, %s2957_s16  ;;  %v3721_v25 = vpop.permute.xlu1 %1375  ;;  %1968 = vrot.lane.b32.xlu0 %v3717_v24, %s2957_s16  ;;  %v3725_v41 = vpop.permute.xlu0 %1373 }
  0xf6   : > { %5059 = vst [vmem:[#allocation24_spill] sm:$0xff] %v3721_v25  ;;  %5060 = vst [vmem:[#allocation25_spill] sm:$0xff] %v3725_v41 }
  0xf9   : > { %1974 = vrot.lane.b32.xlu1 %v3728_v35, %s2957_s16  ;;  %v3735_v54 = vpop.permute.xlu1 %1379  ;;  %1972 = vrot.lane.b32.xlu0 %v3731_v12, %s2957_s16  ;;  %v3739_v55 = vpop.permute.xlu0 %1377 }
  0xfa   : > { %5063 = vst [vmem:[#allocation28_spill] sm:$0xff] %v3735_v54  ;;  %5064 = vst [vmem:[#allocation29_spill] sm:$0xff] %v3739_v55 }
  0xfd   : > { %1978 = vrot.lane.b32.xlu1 %v3742_v13, %s2957_s16  ;;  %v3749_v27 = vpop.permute.xlu1 %1383  ;;  %1976 = vrot.lane.b32.xlu0 %v3745_v26, %s2957_s16  ;;  %v3753_v33 = vpop.permute.xlu0 %1381 }
  0xfe   : > { %5067 = vst [vmem:[#allocation32_spill] sm:$0xff] %v3749_v27  ;;  %5068 = vst [vmem:[#allocation33_spill] sm:$0xff] %v3753_v33 }
 0x101   : > { %1982 = vrot.lane.b32.xlu1 %v3756_v1, %s2957_s16  ;;  %v3763_v56 = vpop.permute.xlu1 %1387  ;;  %1980 = vrot.lane.b32.xlu0 %v3759_v6, %s2957_s16 }
 0x102   : > { %5071 = vst [vmem:[#allocation36_spill] sm:$0xff] %v3763_v56  ;;  %v3770_v42 = vpop.permute.xlu0 %1385 }
 0x103   : > { %5073 = vst [vmem:[#allocation38_spill] sm:$0xff] %v3770_v42 }
 0x105   : > { %1986 = vrot.lane.b32.xlu1 %v3768_v57, %s2957_s16  ;;  %v3777_v29 = vpop.permute.xlu1 %1391  ;;  %1984 = vrot.lane.b32.xlu0 %v3773_v28, %s2957_s16 }
 0x106   : > { %5075 = vst [vmem:[#allocation40_spill] sm:$0xff] %v3777_v29  ;;  %v3784_v7 = vpop.permute.xlu0 %1389 }
 0x107   : > { %5077 = vst [vmem:[#allocation42_spill] sm:$0xff] %v3784_v7 }
 0x109   : > { %1990 = vrot.lane.b32.xlu1 %v3782_v43, %s2957_s16  ;;  %1988 = vrot.lane.b32.xlu0 %v3787_v14, %s2957_s16 }
 0x10b   : > { %v3799_v0 = vpop.permute.xlu1 %1395  ;;  %v3801_v58 = vpop.permute.xlu0 %1393 }
 0x10c   : > { %5081 = vst [vmem:[#allocation46_spill] sm:$0xff] %v3799_v0  ;;  %5082 = vst [vmem:[#allocation47_spill] sm:$0xff] %v3801_v58 }
 0x10d   : > { %1994 = vrot.lane.b32.xlu1 %v3794_v15, %s2957_s16  ;;  %1992 = vrot.lane.b32.xlu0 %v3797_v62, %s2957_s16  ;;  %v3836_v15 = vld [vmem:[%s3225_s9 + $0x1f8] sm:$0xff] }
 0x10e   : > { %5087 = vst [vmem:[#allocation52_spill] sm:$0xff] %v3836_v15 }
 0x10f   : > { %v3813_v16 = vpop.permute.xlu1 %1559  ;;  %v3815_v17 = vpop.permute.xlu0 %1557 }
 0x111   : > { %1998 = vrot.lane.b32.xlu1 %v3808_v60, %s2957_s16  ;;  %1996 = vrot.lane.b32.xlu0 %v3811_v45, %s2957_s16  ;;  %v3839_v60 = vld [vmem:[%s3225_s9 + $0x1f0] sm:$0xff]  ;;  %s2885_s9 = scalar_lea.vmem %s2884_s8, 16384 }
 0x112   : > { %5088 = vst [vmem:[#allocation53_spill] sm:$0xff] %v3839_v60  ;;  %p2887_p2 = scmp.lt.s32.totalorder %s2885_s9, %s2879_s29 }
 0x113   : > { %v3827_v58 = vpop.permute.xlu1 %1563  ;;  %v3829_v62 = vpop.permute.xlu0 %1561 }
 0x114   : > { %p2888_p3 = por %p2887_p2, %p2886_p1 }
 0x115   : > { %2002 = vrot.lane.b32.xlu1 %v3822_v5, %s2957_s16  ;;  %2000 = vrot.lane.b32.xlu0 %v3825_v46, %s2957_s16 }
 0x116   : > { %p2889_p5 = pnand %p2888_p3, %p2882_p0 }
 0x117   : > { %v3841_v14 = vpop.permute.xlu1 %1567  ;;  %v3847_v45 = vpop.permute.xlu0 %1565 }
 0x119   : > { %2006 = vrot.lane.b32.xlu1 %v3836_v15, %s2957_s16  ;;  %2004 = vrot.lane.b32.xlu0 %v3839_v60, %s2957_s16 }
 0x11b   : > { %v3849_v43 = vpop.permute.xlu1 %1571  ;;  %v3851_v5 = vpop.permute.xlu0 %1569 }
 0x11f   : > { %v3853_v28 = vpop.permute.xlu1 %1575  ;;  %v3855_v46 = vpop.permute.xlu0 %1573 }
 0x123   : > { %v3857_v0 = vpop.permute.xlu1 %1579  ;;  %v3859_v57 = vpop.permute.xlu0 %1577 }
 0x127   : > { %v3861_v7 = vpop.permute.xlu1 %1583  ;;  %v3863_v15 = vpop.permute.xlu0 %1581 }
 0x12b   : > { %v3865_v6 = vpop.permute.xlu1 %1587  ;;  %v3867_v60 = vpop.permute.xlu0 %1585 }
 0x12c   : > { %5089 = vst [vmem:[#allocation54_spill] sm:$0xff] %v3865_v6  ;;  %5090 = vst [vmem:[#allocation55_spill] sm:$0xff] %v3867_v60 }
 0x12f   : > { %v3869_v1 = vpop.permute.xlu1 %1591  ;;  %v3871_v26 = vpop.permute.xlu0 %1589 }
 0x130   : > { %5091 = vst [vmem:[#allocation56_spill] sm:$0xff] %v3869_v1  ;;  %5092 = vst [vmem:[#allocation57_spill] sm:$0xff] %v3871_v26 }
 0x133   : > { %v3873_v29 = vpop.permute.xlu1 %1595  ;;  %v3875_v13 = vpop.permute.xlu0 %1593 }
 0x134   : > { %5093 = vst [vmem:[#allocation58_spill] sm:$0xff] %v3873_v29  ;;  %5094 = vst [vmem:[#allocation59_spill] sm:$0xff] %v3875_v13 }
 0x137   : > { %v3877_v42 = vpop.permute.xlu1 %1599  ;;  %v3879_v12 = vpop.permute.xlu0 %1597 }
 0x138   : > { %5095 = vst [vmem:[#allocation60_spill] sm:$0xff] %v3877_v42  ;;  %5096 = vst [vmem:[#allocation61_spill] sm:$0xff] %v3879_v12 }
 0x13b   : > { %v3881_v35 = vpop.permute.xlu1 %1603  ;;  %v3883_v24 = vpop.permute.xlu0 %1601 }
 0x13c   : > { %5097 = vst [vmem:[#allocation62_spill] sm:$0xff] %v3881_v35  ;;  %5098 = vst [vmem:[#allocation63_spill] sm:$0xff] %v3883_v24 }
 0x13f   : > { %v3885_v56 = vpop.permute.xlu1 %1607  ;;  %v3887_v33 = vpop.permute.xlu0 %1605 }
 0x140   : > { %5099 = vst [vmem:[#allocation64_spill] sm:$0xff] %v3885_v56  ;;  %5100 = vst [vmem:[#allocation65_spill] sm:$0xff] %v3887_v33 }
 0x143   : > { %v3895_v55 = vpop.permute.xlu1 %1611  ;;  %v3899_v24 = vpop.permute.xlu0 %1609 }
 0x144   : > { %5101 = vst [vmem:[#allocation66_spill] sm:$0xff] %v3895_v55  ;;  %5102 = vst [vmem:[#allocation67_spill] sm:$0xff] %v3899_v24 }
 0x147   : > { %v3911_v55 = vpop.permute.xlu0 %1613 }
 0x148   : > { %5104 = vst [vmem:[#allocation69_spill] sm:$0xff] %v3911_v55 }
 0x14b   : > { %v3925_v2 = vpop.permute.xlu0 %1617 }
 0x14c   : > { %5106 = vst [vmem:[#allocation71_spill] sm:$0xff] %v3925_v2 }
 0x153   : > { %v2773_v40 = vpop.f32.mrf.mxu1 }
 0x155   : > { %v1110_v22 = vpop.f32.mrf.mxu1 }
 0x157   : > { %v2723_v30 = vpop.f32.mrf.mxu0  ;;  %v2776_v10 = vpop.f32.mrf.mxu1 }
 0x158   : > { %v3889_v61 = vadd.f32 %v2773_v40, %v2723_v30 }
 0x159   : > { %v821_v27 = vpop.f32.mrf.mxu0 }
 0x15a   : > { %v3891_v11 = vadd.f32 %v1110_v22, %v821_v27  ;;  %1463 = vrot.lane.b32.xlu1 %v3889_v61, %s2957_s16  ;;  %v3907_v22 = vpop.permute.xlu1 %1615  ;;  %v1120_v27 = vpop.f32.mrf.mxu1 }
 0x15b   : > { %v2726_v56 = vpop.f32.mrf.mxu0  ;;  %5103 = vst [vmem:[#allocation68_spill] sm:$0xff] %v3907_v22 }
 0x15c   : > { %1461 = vrot.lane.b32.xlu0 %v3891_v11, %s2957_s16  ;;  %v3903_v30 = vadd.f32 %v2776_v10, %v2726_v56  ;;  %v2779_v33 = vpop.f32.mrf.mxu1  ;;  %v1653_v6 = vsel %vm526_vm0, %v3891_v11, %v3598_v36 }
 0x15d   : > { %v831_v40 = vpop.f32.mrf.mxu0 }
 0x15e   : > { %1818 = vrot.lane.b32.xlu1 %v3889_v61, %s2959_s11  ;;  %v3915_v10 = vadd.f32 %v1120_v27, %v831_v40  ;;  %v3919_v56 = vpop.permute.xlu1 %1619  ;;  %v1130_v35 = vpop.f32.mrf.mxu1 }
 0x15f   : > { %v2729_v24 = vpop.f32.mrf.mxu0  ;;  %5105 = vst [vmem:[#allocation70_spill] sm:$0xff] %v3919_v56 }
 0x160   : > { %1816 = vrot.lane.b32.xlu0 %v3891_v11, %s2959_s11  ;;  %v3921_v22 = vadd.f32 %v2779_v33, %v2729_v24  ;;  %v2782_v20 = vpop.f32.mrf.mxu1  ;;  %v3937_v24 = vpop.permute.xlu0 %1944 }
 0x161   : > { %v841_v55 = vpop.f32.mrf.mxu0  ;;  %5108 = vst [vmem:[#allocation73_spill] sm:$0xff] %v3937_v24 }
 0x162   : > { %1467 = vrot.lane.b32.xlu1 %v3903_v30, %s2957_s16  ;;  %v3931_v40 = vpop.permute.xlu1 %1946  ;;  %v3933_v56 = vadd.f32 %v1130_v35, %v841_v55  ;;  %v1140_v54 = vpop.f32.mrf.mxu1 }
 0x163   : > { %5107 = vst [vmem:[#allocation72_spill] sm:$0xff] %v3931_v40  ;;  %v2732_v27 = vpop.f32.mrf.mxu0 }
 0x164   : > { %2040 = vrot.lane.b32.xlu0 %v3891_v11, %s2960_s12  ;;  %v3939_v33 = vadd.f32 %v2782_v20, %v2732_v27  ;;  %v3949_v35 = vpop.permute.xlu0 %1948  ;;  %v2785_v12 = vpop.f32.mrf.mxu1 }
 0x165   : > { %v851_v2 = vpop.f32.mrf.mxu0  ;;  %5110 = vst [vmem:[#allocation75_spill] sm:$0xff] %v3949_v35 }
 0x166   : > { %1822 = vrot.lane.b32.xlu1 %v3903_v30, %s2959_s11  ;;  %v3945_v40 = vpop.permute.xlu1 %1950  ;;  %v3951_v24 = vadd.f32 %v1140_v54, %v851_v2  ;;  %v1150_v38 = vpop.f32.mrf.mxu1 }
 0x167   : > { %5109 = vst [vmem:[#allocation74_spill] sm:$0xff] %v3945_v40  ;;  %v2735_v55 = vpop.f32.mrf.mxu0 }
 0x168   : > { %1465 = vrot.lane.b32.xlu0 %v3915_v10, %s2957_s16  ;;  %v3955_v20 = vadd.f32 %v2785_v12, %v2735_v55  ;;  %v3963_v35 = vpop.permute.xlu0 %1952  ;;  %v2788_v54 = vpop.f32.mrf.mxu1 }
 0x169   : > { %v861_v40 = vpop.f32.mrf.mxu0  ;;  %5112 = vst [vmem:[#allocation77_spill] sm:$0xff] %v3963_v35 }
 0x16a   : > { %1471 = vrot.lane.b32.xlu1 %v3921_v22, %s2957_s16  ;;  %v3959_v27 = vpop.permute.xlu1 %1954  ;;  %v3967_v41 = vadd.f32 %v1150_v38, %v861_v40  ;;  %v1160_v63 = vpop.f32.mrf.mxu1 }
 0x16b   : > { %5111 = vst [vmem:[#allocation76_spill] sm:$0xff] %v3959_v27  ;;  %v2738_v2 = vpop.f32.mrf.mxu0 }
 0x16c   : > { %1820 = vrot.lane.b32.xlu0 %v3915_v10, %s2959_s11  ;;  %v3973_v55 = vadd.f32 %v2788_v54, %v2738_v2  ;;  %v3977_v27 = vpop.permute.xlu0 %1956  ;;  %v2791_v4 = vpop.f32.mrf.mxu1 }
 0x16d   : > { %5114 = vst [vmem:[#allocation79_spill] sm:$0xff] %v3977_v27  ;;  %v871_v35 = vpop.f32.mrf.mxu0 }
 0x16e   : > { %1826 = vrot.lane.b32.xlu1 %v3921_v22, %s2959_s11  ;;  %v3971_v12 = vpop.permute.xlu1 %1958  ;;  %v1170_v42 = vpop.f32.mrf.mxu1 }
 0x16f   : > { %5113 = vst [vmem:[#allocation78_spill] sm:$0xff] %v3971_v12  ;;  %v2741_v40 = vpop.f32.mrf.mxu0  ;;  %v3985_v12 = vadd.f32 %v1160_v63, %v871_v35 }
 0x170   : > { %1469 = vrot.lane.b32.xlu0 %v3933_v56, %s2957_s16  ;;  %v3989_v2 = vpop.permute.xlu0 %1960  ;;  %v3991_v54 = vadd.f32 %v2791_v4, %v2741_v40  ;;  %v2794_v3 = vpop.f32.mrf.mxu1 }
 0x171   : > { %5116 = vst [vmem:[#allocation81_spill] sm:$0xff] %v3989_v2  ;;  %v881_v27 = vpop.f32.mrf.mxu0 }
 0x172   : > { %1475 = vrot.lane.b32.xlu1 %v3939_v33, %s2957_s16  ;;  %v3983_v38 = vpop.permute.xlu1 %1962  ;;  %v4003_v2 = vadd.f32 %v1170_v42, %v881_v27  ;;  %v1180_v25 = vpop.f32.mrf.mxu1 }
 0x173   : > { %5115 = vst [vmem:[#allocation80_spill] sm:$0xff] %v3983_v38  ;;  %v2744_v35 = vpop.f32.mrf.mxu0 }
 0x174   : > { %1824 = vrot.lane.b32.xlu0 %v3933_v56, %s2959_s11  ;;  %v4001_v63 = vpop.permute.xlu0 %1964  ;;  %v4007_v4 = vadd.f32 %v2794_v3, %v2744_v35  ;;  %v2797_v27 = vpop.f32.mrf.mxu1 }
 0x175   : > { %5118 = vst [vmem:[#allocation83_spill] sm:$0xff] %v4001_v63 }
 0x176   : > { %1830 = vrot.lane.b32.xlu1 %v3939_v33, %s2959_s11  ;;  %v3997_v38 = vpop.permute.xlu1 %1966  ;;  %v1190_v31 = vpop.f32.mrf.mxu1 }
 0x177   : > { %5117 = vst [vmem:[#allocation82_spill] sm:$0xff] %v3997_v38  ;;  %v891_v38 = vpop.f32.mrf.mxu0 }
 0x178   : > { %1473 = vrot.lane.b32.xlu0 %v3951_v24, %s2957_s16  ;;  %v4015_v63 = vpop.permute.xlu0 %1968  ;;  %v4019_v13 = vadd.f32 %v1180_v25, %v891_v38  ;;  %v2800_v53 = vpop.f32.mrf.mxu1 }
 0x179   : > { %5120 = vst [vmem:[#allocation85_spill] sm:$0xff] %v4015_v63  ;;  %v2747_v42 = vpop.f32.mrf.mxu0 }
 0x17a   : > { %1479 = vrot.lane.b32.xlu1 %v3955_v20, %s2957_s16  ;;  %v4011_v40 = vpop.permute.xlu1 %1970  ;;  %v4025_v35 = vadd.f32 %v2797_v27, %v2747_v42  ;;  %v1200_v29 = vpop.f32.mrf.mxu1 }
 0x17b   : > { %5119 = vst [vmem:[#allocation84_spill] sm:$0xff] %v4011_v40  ;;  %v901_v63 = vpop.f32.mrf.mxu0 }
 0x17c   : > { %1828 = vrot.lane.b32.xlu0 %v3951_v24, %s2959_s11  ;;  %v4029_v40 = vpop.permute.xlu0 %1972  ;;  %v2803_v52 = vpop.f32.mrf.mxu1 }
 0x17d   : > { %5122 = vst [vmem:[#allocation87_spill] sm:$0xff] %v4029_v40  ;;  %v2750_v38 = vpop.f32.mrf.mxu0 }
 0x17e   : > { %1834 = vrot.lane.b32.xlu1 %v3955_v20, %s2959_s11  ;;  %v4023_v3 = vpop.permute.xlu1 %1974  ;;  %v4043_v27 = vadd.f32 %v2800_v53, %v2750_v38  ;;  %v1210_v26 = vpop.f32.mrf.mxu1 }
 0x17f   : > { %5121 = vst [vmem:[#allocation86_spill] sm:$0xff] %v4023_v3  ;;  %v4037_v3 = vadd.f32 %v1190_v31, %v901_v63  ;;  %v911_v40 = vpop.f32.mrf.mxu0 }
 0x180   : > { %1477 = vrot.lane.b32.xlu0 %v3967_v41, %s2957_s16  ;;  %v4041_v42 = vpop.permute.xlu0 %1976 }
 0x181   : > { %5124 = vst [vmem:[#allocation89_spill] sm:$0xff] %v4041_v42  ;;  %v2753_v63 = vpop.f32.mrf.mxu0  ;;  %v4055_v42 = vadd.f32 %v1200_v29, %v911_v40  ;;  %v2806_v40 = vpop.f32.mrf.mxu1 }
 0x182   : > { %1483 = vrot.lane.b32.xlu1 %v3973_v55, %s2957_s16  ;;  %v4035_v25 = vpop.permute.xlu1 %1978  ;;  %v4059_v53 = vadd.f32 %v2803_v52, %v2753_v63 }
 0x183   : > { %5123 = vst [vmem:[#allocation88_spill] sm:$0xff] %v4035_v25  ;;  %v1220_v1 = vpop.f32.mrf.mxu1 }
 0x184   : > { %1832 = vrot.lane.b32.xlu0 %v3967_v41, %s2959_s11  ;;  %v4053_v31 = vpop.permute.xlu0 %1980 }
 0x185   : > { %5126 = vst [vmem:[#allocation91_spill] sm:$0xff] %v4053_v31  ;;  %v2809_v23 = vpop.f32.mrf.mxu1 }
 0x186   : > { %1838 = vrot.lane.b32.xlu1 %v3973_v55, %s2959_s11  ;;  %v4049_v25 = vpop.permute.xlu1 %1982 }
 0x187   : > { %5125 = vst [vmem:[#allocation90_spill] sm:$0xff] %v4049_v25  ;;  %v921_v25 = vpop.f32.mrf.mxu0  ;;  %v1230_v60 = vpop.f32.mrf.mxu1 }
 0x188   : > { %1481 = vrot.lane.b32.xlu0 %v3985_v12, %s2957_s16  ;;  %v4067_v31 = vpop.permute.xlu0 %1984  ;;  %v4071_v32 = vadd.f32 %v1210_v26, %v921_v25 }
 0x189   : > { %5128 = vst [vmem:[#allocation93_spill] sm:$0xff] %v4067_v31  ;;  %v2756_v29 = vpop.f32.mrf.mxu0  ;;  %v2812_v51 = vpop.f32.mrf.mxu1 }
 0x18a   : > { %1487 = vrot.lane.b32.xlu1 %v3991_v54, %s2957_s16  ;;  %v4063_v38 = vpop.permute.xlu1 %1986  ;;  %v4077_v63 = vadd.f32 %v2806_v40, %v2756_v29 }
 0x18b   : > { %5127 = vst [vmem:[#allocation92_spill] sm:$0xff] %v4063_v38  ;;  %v931_v31 = vpop.f32.mrf.mxu0 }
 0x18c   : > { %1836 = vrot.lane.b32.xlu0 %v3985_v12, %s2959_s11  ;;  %5130 = vst [vmem:[#allocation95_spill] sm:$0xff] %v4077_v63  ;;  %v4081_v38 = vpop.permute.xlu0 %1988 }
 0x18d   : > { %5131 = vst [vmem:[#allocation96_spill] sm:$0xff] %v4081_v38  ;;  %v2759_v25 = vpop.f32.mrf.mxu0 }
 0x18e   : > { %1842 = vrot.lane.b32.xlu1 %v3991_v54, %s2959_s11  ;;  %v4075_v52 = vpop.permute.xlu1 %1990  ;;  %v4095_v40 = vadd.f32 %v2809_v23, %v2759_v25 }
 0x18f   : > { %5129 = vst [vmem:[#allocation94_spill] sm:$0xff] %v4075_v52  ;;  %v4089_v52 = vadd.f32 %v1220_v1, %v931_v31  ;;  %v941_v38 = vpop.f32.mrf.mxu0 }
 0x190   : > { %1485 = vrot.lane.b32.xlu0 %v4003_v2, %s2957_s16  ;;  %v4093_v29 = vpop.permute.xlu0 %1992  ;;  %5135 = vst [vmem:[#allocation100_spill] sm:$0xff] %v4095_v40  ;;  %v4107_v23 = vadd.f32 %v1230_v60, %v941_v38 }
 0x191   : > { %5133 = vst [vmem:[#allocation98_spill] sm:$0xff] %v4089_v52  ;;  %5134 = vst [vmem:[#allocation99_spill] sm:$0xff] %v4093_v29  ;;  %v2762_v31 = vpop.f32.mrf.mxu0 }
 0x192   : > { %1491 = vrot.lane.b32.xlu1 %v4007_v4, %s2957_s16  ;;  %v4087_v26 = vpop.permute.xlu1 %1994  ;;  %5138 = vst [vmem:[#allocation103_spill] sm:$0xff] %v4107_v23  ;;  %v4111_v25 = vadd.f32 %v2812_v51, %v2762_v31 }
 0x193   : > { %5132 = vst [vmem:[#allocation97_spill] sm:$0xff] %v4087_v26 }
 0x194   : > { %1840 = vrot.lane.b32.xlu0 %v4003_v2, %s2959_s11  ;;  %v4105_v1 = vpop.permute.xlu0 %1996  ;;  %5139 = vst [vmem:[#allocation104_spill] sm:$0xff] %v4111_v25 }
 0x195   : > { %5137 = vst [vmem:[#allocation102_spill] sm:$0xff] %v4105_v1 }
 0x196   : > { %1846 = vrot.lane.b32.xlu1 %v4007_v4, %s2959_s11  ;;  %v4101_v26 = vpop.permute.xlu1 %1998 }
 0x197   : > { %5136 = vst [vmem:[#allocation101_spill] sm:$0xff] %v4101_v26  ;;  %v951_v26 = vpop.f32.mrf.mxu0 }
 0x198   : > { %1489 = vrot.lane.b32.xlu0 %v4019_v13, %s2957_s16  ;;  %v4119_v1 = vpop.permute.xlu0 %2000 }
 0x199   : > { %5141 = vst [vmem:[#allocation106_spill] sm:$0xff] %v4119_v1  ;;  %v2765_v60 = vpop.f32.mrf.mxu0 }
 0x19a   : > { %1495 = vrot.lane.b32.xlu1 %v4025_v35, %s2957_s16  ;;  %v4115_v29 = vpop.permute.xlu1 %2002 }
 0x19b   : > { %5140 = vst [vmem:[#allocation105_spill] sm:$0xff] %v4115_v29  ;;  %v961_v1 = vpop.f32.mrf.mxu0 }
 0x19c   : > { %1844 = vrot.lane.b32.xlu0 %v4019_v13, %s2959_s11 }
 0x19e   : > { %1850 = vrot.lane.b32.xlu1 %v4025_v35, %s2959_s11  ;;  %v4127_v31 = vpop.permute.xlu1 %2006 }
 0x19f   : > { %5142 = vst [vmem:[#allocation107_spill] sm:$0xff] %v4127_v31 }
 0x1a0   : > { %1493 = vrot.lane.b32.xlu0 %v4037_v3, %s2957_s16 }
 0x1a2   : > { %1499 = vrot.lane.b32.xlu1 %v4043_v27, %s2957_s16 }
 0x1a4   : > { %1848 = vrot.lane.b32.xlu0 %v4037_v3, %s2959_s11 }
 0x1a6   : > { %1854 = vrot.lane.b32.xlu1 %v4043_v27, %s2959_s11 }
 0x1a8   : > { %1497 = vrot.lane.b32.xlu0 %v4055_v42, %s2957_s16 }
 0x1aa   : > { %1503 = vrot.lane.b32.xlu1 %v4059_v53, %s2957_s16 }
 0x1ac   : > { %1852 = vrot.lane.b32.xlu0 %v4055_v42, %s2959_s11 }
 0x1ae   : > { %1858 = vrot.lane.b32.xlu1 %v4059_v53, %s2959_s11 }
 0x1b0   : > { %1501 = vrot.lane.b32.xlu0 %v4071_v32, %s2957_s16 }
 0x1b2   : > { %1507 = vrot.lane.b32.xlu1 %v4077_v63, %s2957_s16 }
 0x1b4   : > { %1856 = vrot.lane.b32.xlu0 %v4071_v32, %s2959_s11 }
 0x1b6   : > { %1862 = vrot.lane.b32.xlu1 %v4077_v63, %s2959_s11 }
 0x1b8   : > { %1505 = vrot.lane.b32.xlu0 %v4089_v52, %s2957_s16 }
 0x1ba   : > { %1511 = vrot.lane.b32.xlu1 %v4095_v40, %s2957_s16 }
 0x1bc   : > { %1860 = vrot.lane.b32.xlu0 %v4089_v52, %s2959_s11  ;;  %v1240_v52 = vpop.f32.mrf.mxu1 }
 0x1bd   : > { %v4123_v51 = vadd.f32 %v1240_v52, %v951_v26  ;;  %v1654_v26 = vsel %vm526_vm0, %v3889_v61, %v3594_v44 }
 0x1be   : > { %1866 = vrot.lane.b32.xlu1 %v4095_v40, %s2959_s11  ;;  %v2815_v38 = vpop.f32.mrf.mxu1  ;;  %v4134_v40 = vpop.permute.xlu0 %2004 }
 0x1bf   : > { %v4130_v29 = vadd.f32 %v2815_v38, %v2765_v60  ;;  %5143 = vst [vmem:[#allocation108_spill] sm:$0xff] %v4134_v40  ;;  %v2768_v60 = vpop.f32.mrf.mxu0 }
 0x1c0   : > { %1509 = vrot.lane.b32.xlu0 %v4107_v23, %s2957_s16  ;;  %v1250_v63 = vpop.f32.mrf.mxu1 }
 0x1c1   : > { %v4146_v31 = vadd.f32 %v1250_v63, %v961_v1  ;;  %v971_v11 = vpop.f32.mrf.mxu0 }
 0x1c2   : > { %1515 = vrot.lane.b32.xlu1 %v4111_v25, %s2957_s16  ;;  %v2818_v38 = vpop.f32.mrf.mxu1 }
 0x1c3   : > { %v4160_v63 = vadd.f32 %v2818_v38, %v2768_v60  ;;  %v1655_v38 = vsel %vm526_vm0, %v3915_v10, %v3610_v8 }
 0x1c4   : > { %1864 = vrot.lane.b32.xlu0 %v4107_v23, %s2959_s11 }
 0x1c6   : > { %1870 = vrot.lane.b32.xlu1 %v4111_v25, %s2959_s11 }
 0x1c8   : > { %1513 = vrot.lane.b32.xlu0 %v4123_v51, %s2957_s16 }
 0x1ca   : > { %1519 = vrot.lane.b32.xlu1 %v4130_v29, %s2957_s16 }
 0x1cc   : > { %v1464_v52 = vpop.permute.xlu1 %1463  ;;  %1868 = vrot.lane.b32.xlu0 %v4123_v51, %s2959_s11 }
 0x1cd   : > { %v1686_v40 = vsel %vm674_vm1, %v1654_v26, %v1464_v52 }
 0x1ce   : > { %v1719_v25 = vsel %vm1717_vm3, %v1686_v40, %v3813_v16  ;;  %v1462_v23 = vpop.permute.xlu0 %1461  ;;  %1874 = vrot.lane.b32.xlu1 %v4130_v29, %s2959_s11 }
 0x1cf   : > { %1752 = vst.msk [vmem:[%s4155_s15 + $0x8] sm:$0xff] %vm1750_vm4, %v1719_v25  ;;  %v1685_v44 = vsel %vm674_vm1, %v1653_v6, %v1462_v23  ;;  %v1260_v6 = vpop.f32.mrf.mxu1 }
 0x1d0   : > { %v1718_v16 = vsel %vm1717_vm3, %v1685_v44, %v3815_v17  ;;  %v4164_v40 = vpop.permute.xlu1 %1818  ;;  %1517 = vrot.lane.b32.xlu0 %v4146_v31, %s2957_s16  ;;  %v1656_v17 = vsel %vm526_vm0, %v3903_v30, %v3606_v37  ;;  %v4180_v25 = vadd.f32 %v1260_v6, %v971_v11  ;;  %v1658_v11 = vsel %vm526_vm0, %v3921_v22, %v3615_v47 }
 0x1d1   : > { %1751 = vst.msk [vmem:[%s4155_s15] sm:$0xff] %vm1750_vm4, %v1718_v16 }
 0x1d2   : > { %v4170_v36 = vpop.permute.xlu0 %1816  ;;  %1523 = vrot.lane.b32.xlu1 %v4160_v63, %s2957_s16 }
 0x1d4   : > { %v1468_v1 = vpop.permute.xlu1 %1467  ;;  %1872 = vrot.lane.b32.xlu0 %v4146_v31, %s2959_s11 }
 0x1d5   : > { %v1688_v23 = vsel %vm674_vm1, %v1656_v17, %v1468_v1  ;;  %v1657_v1 = vsel %vm526_vm0, %v3933_v56, %v3619_v9 }
 0x1d6   : > { %v1721_v52 = vsel %vm1717_vm3, %v1688_v23, %v3827_v58  ;;  %v4184_v26 = vpop.permute.xlu0 %2040  ;;  %1878 = vrot.lane.b32.xlu1 %v4160_v63, %s2959_s11  ;;  %v1660_v23 = vsel %vm526_vm0, %v3939_v33, %v3623_v18 }
 0x1d7   : > { %1754 = vst.msk [vmem:[%s4155_s15 + $0x28] sm:$0xff] %vm1750_vm4, %v1721_v52 }
 0x1d8   : > { %v4190_v37 = vpop.permute.xlu1 %1822  ;;  %1521 = vrot.lane.b32.xlu0 %v4180_v25, %s2957_s16  ;;  %s2651_s16 = sshll.u32 %s2947_s21, 13 }
 0x1d9   : > { %s4907_s25 = scalar_lea.hbm %s4971_s5, %s2651_s16 }
 0x1da   : > { %v1466_v60 = vpop.permute.xlu0 %1465  ;;  %2042 = vrot.lane.b32.xlu1 %v3889_v61, %s2960_s12 }
 0x1db   : > { %v1687_v58 = vsel %vm674_vm1, %v1655_v38, %v1466_v60  ;;  %v1662_v60 = vsel %vm526_vm0, %v3955_v20, %v3637_v59 }
 0x1dc   : > { %v1720_v44 = vsel %vm1717_vm3, %v1687_v58, %v3829_v62  ;;  %v1472_v16 = vpop.permute.xlu1 %1471  ;;  %1876 = vrot.lane.b32.xlu0 %v4180_v25, %s2959_s11 }
 0x1dd   : > { %1753 = vst.msk [vmem:[%s4155_s15 + $0x20] sm:$0xff] %vm1750_vm4, %v1720_v44  ;;  %v1690_v8 = vsel %vm674_vm1, %v1658_v11, %v1472_v16  ;;  %v1664_v16 = vsel %vm526_vm0, %v3973_v55, %v3651_v48 }
 0x1de   : > { %v1723_v61 = vsel %vm1717_vm3, %v1690_v8, %v3841_v14  ;;  %v4212_v6 = vpop.permute.xlu0 %1820  ;;  %2046 = vrot.lane.b32.xlu1 %v3903_v30, %s2960_s12 }
 0x1df   : > { %1756 = vst.msk [vmem:[%s4155_s15 + $0x48] sm:$0xff] %vm1750_vm4, %v1723_v61 }
 0x1e0   : > { %v4218_v47 = vpop.permute.xlu1 %1826  ;;  %2044 = vrot.lane.b32.xlu0 %v3915_v10, %s2960_s12 }
 0x1e2   : > { %v1470_v62 = vpop.permute.xlu0 %1469  ;;  %2050 = vrot.lane.b32.xlu1 %v3921_v22, %s2960_s12 }
 0x1e3   : > { %v1689_v14 = vsel %vm674_vm1, %v1657_v1, %v1470_v62  ;;  %v1666_v62 = vsel %vm526_vm0, %v3991_v54, %v3665_v21 }
 0x1e4   : > { %v1722_v30 = vsel %vm1717_vm3, %v1689_v14, %v3847_v45  ;;  %v1476_v17 = vpop.permute.xlu1 %1475  ;;  %2048 = vrot.lane.b32.xlu0 %v3933_v56, %s2960_s12  ;;  %v1659_v56 = vsel %vm526_vm0, %v3951_v24, %v3627_v19 }
 0x1e5   : > { %1755 = vst.msk [vmem:[%s4155_s15 + $0x40] sm:$0xff] %vm1750_vm4, %v1722_v30  ;;  %v1692_v9 = vsel %vm674_vm1, %v1660_v23, %v1476_v17  ;;  %v1668_v17 = vsel %vm526_vm0, %v4007_v4, %v3679_v50 }
 0x1e6   : > { %v1725_v22 = vsel %vm1717_vm3, %v1692_v9, %v3849_v43  ;;  %v4240_v10 = vpop.permute.xlu0 %1824  ;;  %2054 = vrot.lane.b32.xlu1 %v3939_v33, %s2960_s12 }
 0x1e7   : > { %1758 = vst.msk [vmem:[%s4155_s15 + $0x68] sm:$0xff] %vm1750_vm4, %v1725_v22 }
 0x1e8   : > { %v4246_v18 = vpop.permute.xlu1 %1830  ;;  %2052 = vrot.lane.b32.xlu0 %v3951_v24, %s2960_s12 }
 0x1ea   : > { %v1474_v45 = vpop.permute.xlu0 %1473  ;;  %2058 = vrot.lane.b32.xlu1 %v3955_v20, %s2960_s12  ;;  %v1661_v20 = vsel %vm526_vm0, %v3967_v41, %v3641_v34 }
 0x1eb   : > { %v1691_v43 = vsel %vm674_vm1, %v1659_v56, %v1474_v45  ;;  %v5147_v45 = vld [vmem:[#allocation13_spill] sm:$0xff] }
 0x1ec   : > { %v1724_v33 = vsel %vm1717_vm3, %v1691_v43, %v3851_v5  ;;  %v1480_v52 = vpop.permute.xlu1 %1479  ;;  %2056 = vrot.lane.b32.xlu0 %v3967_v41, %s2960_s12  ;;  %v1667_v56 = vsel %vm526_vm0, %v4019_v13, %v5147_v45  ;;  %v5148_v43 = vld [vmem:[#allocation100_spill] sm:$0xff] }
 0x1ed   : > { %1757 = vst.msk [vmem:[%s4155_s15 + $0x60] sm:$0xff] %vm1750_vm4, %v1724_v33  ;;  %v1694_v19 = vsel %vm674_vm1, %v1662_v60, %v1480_v52  ;;  %v5149_v52 = vld [vmem:[#allocation55_spill] sm:$0xff]  ;;  %v5161_v45 = vld [vmem:[#allocation24_spill] sm:$0xff] }
 0x1ee   : > { %v1727_v24 = vsel %vm1717_vm3, %v1694_v19, %v3853_v28  ;;  %v4268_v38 = vpop.permute.xlu0 %1828  ;;  %2062 = vrot.lane.b32.xlu1 %v3973_v55, %s2960_s12  ;;  %v1663_v55 = vsel %vm526_vm0, %v3985_v12, %v3655_v49 }
 0x1ef   : > { %1760 = vst.msk [vmem:[%s4155_s15 + $0x88] sm:$0xff] %vm1750_vm4, %v1727_v24  ;;  %v5150_v24 = vld [vmem:[#allocation16_spill] sm:$0xff] }
 0x1f0   : > { %v4274_v59 = vpop.permute.xlu1 %1834  ;;  %2060 = vrot.lane.b32.xlu0 %v3985_v12, %s2960_s12 }
 0x1f2   : > { %v1478_v5 = vpop.permute.xlu0 %1477  ;;  %2066 = vrot.lane.b32.xlu1 %v3991_v54, %s2960_s12  ;;  %v1665_v54 = vsel %vm526_vm0, %v4003_v2, %v3669_v39 }
 0x1f3   : > { %v1693_v28 = vsel %vm674_vm1, %v1661_v20, %v1478_v5  ;;  %v1670_v5 = vsel %vm526_vm0, %v4025_v35, %v5150_v24  ;;  %v5151_v20 = vld [vmem:[#allocation103_spill] sm:$0xff]  ;;  %v5164_v24 = vld [vmem:[#allocation6_spill] sm:$0xff] }
 0x1f4   : > { %v1726_v58 = vsel %vm1717_vm3, %v1693_v28, %v3855_v46  ;;  %v1484_v44 = vpop.permute.xlu1 %1483  ;;  %2064 = vrot.lane.b32.xlu0 %v4003_v2, %s2960_s12  ;;  %v5144_v2 = vld [vmem:[#allocation54_spill] sm:$0xff]  ;;  %v5152_v28 = vld [vmem:[#allocation56_spill] sm:$0xff] }
 0x1f5   : > { %1759 = vst.msk [vmem:[%s4155_s15 + $0x80] sm:$0xff] %vm1750_vm4, %v1726_v58  ;;  %v1696_v34 = vsel %vm674_vm1, %v1664_v16, %v1484_v44  ;;  %v5153_v16 = vld [vmem:[#allocation104_spill] sm:$0xff] }
 0x1f6   : > { %v1729_v41 = vsel %vm1717_vm3, %v1696_v34, %v3857_v0  ;;  %v4296_v11 = vpop.permute.xlu0 %1832  ;;  %2070 = vrot.lane.b32.xlu1 %v4007_v4, %s2960_s12  ;;  %v5146_v4 = vld [vmem:[#allocation98_spill] sm:$0xff] }
 0x1f7   : > { %1762 = vst.msk [vmem:[%s4155_s15 + $0xa8] sm:$0xff] %vm1750_vm4, %v1729_v41  ;;  %v5154_v41 = vld [vmem:[#allocation17_spill] sm:$0xff] }
 0x1f8   : > { %v4302_v48 = vpop.permute.xlu1 %1838  ;;  %2068 = vrot.lane.b32.xlu0 %v4019_v13, %s2960_s12 }
 0x1fa   : > { %v1482_v46 = vpop.permute.xlu0 %1481  ;;  %2074 = vrot.lane.b32.xlu1 %v4025_v35, %s2960_s12 }
 0x1fb   : > { %v1695_v0 = vsel %vm674_vm1, %v1663_v55, %v1482_v46  ;;  %v1669_v46 = vsel %vm526_vm0, %v4037_v3, %v5154_v41 }
 0x1fc   : > { %v1728_v8 = vsel %vm1717_vm3, %v1695_v0, %v3859_v57  ;;  %v1488_v61 = vpop.permute.xlu1 %1487  ;;  %2072 = vrot.lane.b32.xlu0 %v4037_v3, %s2960_s12  ;;  %v5155_v0 = vld [vmem:[#allocation57_spill] sm:$0xff] }
 0x1fd   : > { %1761 = vst.msk [vmem:[%s4155_s15 + $0xa0] sm:$0xff] %vm1750_vm4, %v1728_v8  ;;  %v1698_v49 = vsel %vm674_vm1, %v1666_v62, %v1488_v61  ;;  %v5156_v62 = vld [vmem:[#allocation20_spill] sm:$0xff] }
 0x1fe   : > { %v1731_v12 = vsel %vm1717_vm3, %v1698_v49, %v3861_v7  ;;  %v4324_v1 = vpop.permute.xlu0 %1836  ;;  %2078 = vrot.lane.b32.xlu1 %v4043_v27, %s2960_s12  ;;  %v1672_v49 = vsel %vm526_vm0, %v4043_v27, %v5156_v62  ;;  %v5170_v62 = vld [vmem:[#allocation10_spill] sm:$0xff] }
 0x1ff   : > { %1764 = vst.msk [vmem:[%s4155_s15 + $0xc8] sm:$0xff] %vm1750_vm4, %v1731_v12  ;;  %v5157_v12 = vld [vmem:[#allocation58_spill] sm:$0xff] }
 0x200   : > { %v4330_v21 = vpop.permute.xlu1 %1842  ;;  %2076 = vrot.lane.b32.xlu0 %v4055_v42, %s2960_s12 }
 0x202   : > { %v1486_v57 = vpop.permute.xlu0 %1485  ;;  %2082 = vrot.lane.b32.xlu1 %v4059_v53, %s2960_s12 }
 0x203   : > { %v1697_v7 = vsel %vm674_vm1, %v1665_v54, %v1486_v57 }
 0x204   : > { %v1730_v14 = vsel %vm1717_vm3, %v1697_v7, %v3863_v15  ;;  %v1492_v30 = vpop.permute.xlu1 %1491  ;;  %2080 = vrot.lane.b32.xlu0 %v4071_v32, %s2960_s12  ;;  %v5145_v15 = vld [vmem:[#allocation95_spill] sm:$0xff] }
 0x205   : > { %1763 = vst.msk [vmem:[%s4155_s15 + $0xc0] sm:$0xff] %vm1750_vm4, %v1730_v14  ;;  %v1700_v39 = vsel %vm674_vm1, %v1668_v17, %v1492_v30  ;;  %v5158_v14 = vld [vmem:[#allocation21_spill] sm:$0xff]  ;;  %v5159_v17 = vld [vmem:[#allocation7_spill] sm:$0xff] }
 0x206   : > { %v1733_v23 = vsel %vm1717_vm3, %v1700_v39, %v5144_v2  ;;  %v4352_v9 = vpop.permute.xlu0 %1840  ;;  %2086 = vrot.lane.b32.xlu1 %v5145_v15, %s2960_s12  ;;  %v1671_v30 = vsel %vm526_vm0, %v4055_v42, %v5158_v14  ;;  %v5160_v2 = vld [vmem:[#allocation59_spill] sm:$0xff] }
 0x207   : > { %1766 = vst.msk [vmem:[%s4155_s15 + $0xe8] sm:$0xff] %vm1750_vm4, %v1733_v23 }
 0x208   : > { %v4358_v50 = vpop.permute.xlu1 %1846  ;;  %2084 = vrot.lane.b32.xlu0 %v5146_v4, %s2960_s12 }
 0x20a   : > { %v1490_v22 = vpop.permute.xlu0 %1489  ;;  %2090 = vrot.lane.b32.xlu1 %v5148_v43, %s2960_s12 }
 0x20b   : > { %v1699_v33 = vsel %vm674_vm1, %v1667_v56, %v1490_v22  ;;  %v1674_v56 = vsel %vm526_vm0, %v4059_v53, %v5161_v45 }
 0x20c   : > { %v1732_v60 = vsel %vm1717_vm3, %v1699_v33, %v5149_v52  ;;  %v1496_v19 = vpop.permute.xlu1 %1495  ;;  %2088 = vrot.lane.b32.xlu0 %v5151_v20, %s2960_s12  ;;  %v5162_v33 = vld [vmem:[#allocation5_spill] sm:$0xff]  ;;  %v5163_v52 = vld [vmem:[#allocation60_spill] sm:$0xff] }
 0x20d   : > { %1765 = vst.msk [vmem:[%s4155_s15 + $0xe0] sm:$0xff] %vm1750_vm4, %v1732_v60  ;;  %v1702_v13 = vsel %vm674_vm1, %v1670_v5, %v1496_v19  ;;  %v5165_v5 = vld [vmem:[#allocation8_spill] sm:$0xff] }
 0x20e   : > { %v1735_v58 = vsel %vm1717_vm3, %v1702_v13, %v5152_v28  ;;  %v4380_v44 = vpop.permute.xlu0 %1844  ;;  %2094 = vrot.lane.b32.xlu1 %v5153_v16, %s2960_s12  ;;  %v5166_v28 = vld [vmem:[#allocation25_spill] sm:$0xff] }
 0x20f   : > { %1768 = vst.msk [vmem:[%s4155_s15 + $0x108] sm:$0xff] %vm1750_vm4, %v1735_v58  ;;  %v1673_v58 = vsel %vm526_vm0, %v4071_v32, %v5166_v28 }
 0x210   : > { %v4386_v35 = vpop.permute.xlu1 %1850  ;;  %2092 = vrot.lane.b32.xlu0 %v4123_v51, %s2960_s12 }
 0x212   : > { %v1494_v34 = vpop.permute.xlu0 %1493  ;;  %2098 = vrot.lane.b32.xlu1 %v4130_v29, %s2960_s12 }
 0x213   : > { %v1701_v55 = vsel %vm674_vm1, %v1669_v46, %v1494_v34  ;;  %v5167_v34 = vld [vmem:[#allocation9_spill] sm:$0xff] }
 0x214   : > { %v1734_v8 = vsel %vm1717_vm3, %v1701_v55, %v5155_v0  ;;  %v1500_v61 = vpop.permute.xlu1 %1499  ;;  %2096 = vrot.lane.b32.xlu0 %v4146_v31, %s2960_s12  ;;  %v5168_v46 = vld [vmem:[#allocation61_spill] sm:$0xff] }
 0x215   : > { %1767 = vst.msk [vmem:[%s4155_s15 + $0x100] sm:$0xff] %vm1750_vm4, %v1734_v8  ;;  %v1704_v3 = vsel %vm674_vm1, %v1672_v49, %v1500_v61  ;;  %v5169_v8 = vld [vmem:[#allocation28_spill] sm:$0xff]  ;;  %v5171_v49 = vld [vmem:[#allocation62_spill] sm:$0xff] }
 0x216   : > { %v1737_v57 = vsel %vm1717_vm3, %v1704_v3, %v5157_v12  ;;  %v4408_v54 = vpop.permute.xlu0 %1848  ;;  %2102 = vrot.lane.b32.xlu1 %v4160_v63, %s2960_s12  ;;  %v1676_v61 = vsel %vm526_vm0, %v5145_v15, %v5169_v8 }
 0x217   : > { %1770 = vst.msk [vmem:[%s4155_s15 + $0x128] sm:$0xff] %vm1750_vm4, %v1737_v57  ;;  %v5172_v57 = vld [vmem:[#allocation11_spill] sm:$0xff] }
 0x218   : > { %v4414_v27 = vpop.permute.xlu1 %1854  ;;  %2100 = vrot.lane.b32.xlu0 %v4180_v25, %s2960_s12 }
 0x21a   : > { %v1498_v7 = vpop.permute.xlu0 %1497  ;;  %2138 = vrot.lane.b32.xlu1 %v5159_v17, %s2958_s10 }
 0x21b   : > { %v1703_v39 = vsel %vm674_vm1, %v1671_v30, %v1498_v7  ;;  %v5173_v7 = vld [vmem:[#allocation12_spill] sm:$0xff]  ;;  %v5174_v30 = vld [vmem:[#allocation29_spill] sm:$0xff] }
 0x21c   : > { %v1736_v23 = vsel %vm1717_vm3, %v1703_v39, %v5160_v2  ;;  %v1504_v22 = vpop.permute.xlu1 %1503  ;;  %2136 = vrot.lane.b32.xlu0 %v5162_v33, %s2958_s10  ;;  %v1675_v17 = vsel %vm526_vm0, %v5146_v4, %v5174_v30  ;;  %v5175_v39 = vld [vmem:[#allocation14_spill] sm:$0xff] }
 0x21d   : > { %1769 = vst.msk [vmem:[%s4155_s15 + $0x120] sm:$0xff] %vm1750_vm4, %v1736_v23  ;;  %v1706_v42 = vsel %vm674_vm1, %v1674_v56, %v1504_v22  ;;  %v5176_v23 = vld [vmem:[#allocation63_spill] sm:$0xff]  ;;  %v5177_v56 = vld [vmem:[#allocation32_spill] sm:$0xff] }
 0x21e   : > { %v1739_v60 = vsel %vm1717_vm3, %v1706_v42, %v5163_v52  ;;  %v4436_v19 = vpop.permute.xlu0 %1852  ;;  %2142 = vrot.lane.b32.xlu1 %v5164_v24, %s2958_s10  ;;  %v1678_v33 = vsel %vm526_vm0, %v5148_v43, %v5177_v56  ;;  %v5178_v42 = vld [vmem:[#allocation15_spill] sm:$0xff]  ;;  %v5179_v52 = vld [vmem:[#allocation64_spill] sm:$0xff] }
 0x21f   : > { %1772 = vst.msk [vmem:[%s4155_s15 + $0x148] sm:$0xff] %vm1750_vm4, %v1739_v60 }
 0x220   : > { %v4442_v53 = vpop.permute.xlu1 %1858  ;;  %2140 = vrot.lane.b32.xlu0 %v5165_v5, %s2958_s10  ;;  %v5180_v5 = vld [vmem:[#allocation18_spill] sm:$0xff] }
 0x222   : > { %v1502_v13 = vpop.permute.xlu0 %1501  ;;  %2146 = vrot.lane.b32.xlu1 %v5167_v34, %s2958_s10 }
 0x223   : > { %v1705_v41 = vsel %vm674_vm1, %v1673_v58, %v1502_v13  ;;  %v5181_v13 = vld [vmem:[#allocation19_spill] sm:$0xff]  ;;  %v5182_v58 = vld [vmem:[#allocation33_spill] sm:$0xff] }
 0x224   : > { %v1738_v55 = vsel %vm1717_vm3, %v1705_v41, %v5168_v46  ;;  %v1508_v0 = vpop.permute.xlu1 %1507  ;;  %2144 = vrot.lane.b32.xlu0 %v5170_v62, %s2958_s10  ;;  %v1677_v34 = vsel %vm526_vm0, %v5151_v20, %v5182_v58  ;;  %v5183_v41 = vld [vmem:[#allocation22_spill] sm:$0xff] }
 0x225   : > { %1771 = vst.msk [vmem:[%s4155_s15 + $0x140] sm:$0xff] %vm1750_vm4, %v1738_v55  ;;  %v1708_v32 = vsel %vm674_vm1, %v1676_v61, %v1508_v0  ;;  %v5184_v55 = vld [vmem:[#allocation65_spill] sm:$0xff]  ;;  %v5185_v61 = vld [vmem:[#allocation36_spill] sm:$0xff] }
 0x226   : > { %v1741_v3 = vsel %vm1717_vm3, %v1708_v32, %v5171_v49  ;;  %v4464_v12 = vpop.permute.xlu0 %1856  ;;  %2150 = vrot.lane.b32.xlu1 %v5172_v57, %s2958_s10  ;;  %v1680_v62 = vsel %vm526_vm0, %v5153_v16, %v5185_v61  ;;  %v5186_v32 = vld [vmem:[#allocation23_spill] sm:$0xff]  ;;  %v5187_v49 = vld [vmem:[#allocation66_spill] sm:$0xff] }
 0x227   : > { %1774 = vst.msk [vmem:[%s4155_s15 + $0x168] sm:$0xff] %vm1750_vm4, %v1741_v3 }
 0x228   : > { %v4470_v15 = vpop.permute.xlu1 %1862  ;;  %2148 = vrot.lane.b32.xlu0 %v5173_v7, %s2958_s10  ;;  %v5188_v7 = vld [vmem:[#allocation26_spill] sm:$0xff] }
 0x22a   : > { %v1506_v14 = vpop.permute.xlu0 %1505  ;;  %2154 = vrot.lane.b32.xlu1 %v5175_v39, %s2958_s10 }
 0x22b   : > { %v1707_v2 = vsel %vm674_vm1, %v1675_v17, %v1506_v14  ;;  %v5189_v14 = vld [vmem:[#allocation27_spill] sm:$0xff]  ;;  %v5190_v17 = vld [vmem:[#allocation38_spill] sm:$0xff] }
 0x22c   : > { %v1740_v22 = vsel %vm1717_vm3, %v1707_v2, %v5176_v23  ;;  %v1512_v45 = vpop.permute.xlu1 %1511  ;;  %2152 = vrot.lane.b32.xlu0 %v5178_v42, %s2958_s10  ;;  %v1679_v39 = vsel %vm526_vm0, %v4123_v51, %v5190_v17  ;;  %v5191_v2 = vld [vmem:[#allocation30_spill] sm:$0xff]  ;;  %v5210_v17 = vld [vmem:[#allocation44_spill] sm:$0xff] }
 0x22d   : > { %1773 = vst.msk [vmem:[%s4155_s15 + $0x160] sm:$0xff] %vm1750_vm4, %v1740_v22  ;;  %v1710_v4 = vsel %vm674_vm1, %v1678_v33, %v1512_v45  ;;  %v5192_v22 = vld [vmem:[#allocation67_spill] sm:$0xff]  ;;  %v5193_v33 = vld [vmem:[#allocation40_spill] sm:$0xff] }
 0x22e   : > { %v1743_v60 = vsel %vm1717_vm3, %v1710_v4, %v5179_v52  ;;  %v4492_v24 = vpop.permute.xlu0 %1860  ;;  %2158 = vrot.lane.b32.xlu1 %v5180_v5, %s2958_s10  ;;  %v1682_v42 = vsel %vm526_vm0, %v4130_v29, %v5193_v33  ;;  %v5194_v4 = vld [vmem:[#allocation31_spill] sm:$0xff]  ;;  %v5195_v52 = vld [vmem:[#allocation68_spill] sm:$0xff] }
 0x22f   : > { %1776 = vst.msk [vmem:[%s4155_s15 + $0x188] sm:$0xff] %vm1750_vm4, %v1743_v60 }
 0x230   : > { %v4498_v43 = vpop.permute.xlu1 %1866  ;;  %2156 = vrot.lane.b32.xlu0 %v5181_v13, %s2958_s10  ;;  %v5197_v13 = vld [vmem:[#allocation34_spill] sm:$0xff] }
 0x232   : > { %v1510_v28 = vpop.permute.xlu0 %1509  ;;  %2162 = vrot.lane.b32.xlu1 %v5183_v41, %s2958_s10 }
 0x233   : > { %v1709_v46 = vsel %vm674_vm1, %v1677_v34, %v1510_v28  ;;  %v5199_v28 = vld [vmem:[#allocation35_spill] sm:$0xff]  ;;  %v5200_v34 = vld [vmem:[#allocation42_spill] sm:$0xff] }
 0x234   : > { %v1742_v0 = vsel %vm1717_vm3, %v1709_v46, %v5184_v55  ;;  %v1516_v8 = vpop.permute.xlu1 %1515  ;;  %2160 = vrot.lane.b32.xlu0 %v5186_v32, %s2958_s10  ;;  %v1681_v41 = vsel %vm526_vm0, %v4146_v31, %v5200_v34  ;;  %v5201_v46 = vld [vmem:[#allocation37_spill] sm:$0xff]  ;;  %v5219_v34 = vld [vmem:[#allocation52_spill] sm:$0xff] }
 0x235   : > { %1775 = vst.msk [vmem:[%s4155_s15 + $0x180] sm:$0xff] %vm1750_vm4, %v1742_v0  ;;  %v1712_v20 = vsel %vm674_vm1, %v1680_v62, %v1516_v8  ;;  %v5202_v0 = vld [vmem:[#allocation69_spill] sm:$0xff]  ;;  %v5203_v62 = vld [vmem:[#allocation46_spill] sm:$0xff] }
 0x236   : > { %v1745_v3 = vsel %vm1717_vm3, %v1712_v20, %v5187_v49  ;;  %v4520_v57 = vpop.permute.xlu0 %1864  ;;  %2166 = vrot.lane.b32.xlu1 %v5188_v7, %s2958_s10  ;;  %v1684_v32 = vsel %vm526_vm0, %v4160_v63, %v5203_v62  ;;  %v5204_v20 = vld [vmem:[#allocation39_spill] sm:$0xff]  ;;  %v5205_v49 = vld [vmem:[#allocation70_spill] sm:$0xff] }
 0x237   : > { %1778 = vst.msk [vmem:[%s4155_s15 + $0x1a8] sm:$0xff] %vm1750_vm4, %v1745_v3  ;;  %v5209_v63 = vld [vmem:[#allocation43_spill] sm:$0xff] }
 0x238   : > { %v4526_v16 = vpop.permute.xlu1 %1870  ;;  %2164 = vrot.lane.b32.xlu0 %v5189_v14, %s2958_s10  ;;  %v5207_v14 = vld [vmem:[#allocation41_spill] sm:$0xff] }
 0x23a   : > { %v1514_v30 = vpop.permute.xlu0 %1513  ;;  %2170 = vrot.lane.b32.xlu1 %v5191_v2, %s2958_s10  ;;  %v5211_v2 = vld [vmem:[#allocation47_spill] sm:$0xff] }
 0x23b   : > { %v1711_v23 = vsel %vm674_vm1, %v1679_v39, %v1514_v30 }
 0x23c   : > { %v1744_v45 = vsel %vm1717_vm3, %v1711_v23, %v5192_v22  ;;  %v1520_v56 = vpop.permute.xlu1 %1519  ;;  %2168 = vrot.lane.b32.xlu0 %v5194_v4, %s2958_s10  ;;  %v1683_v23 = vsel %vm526_vm0, %v4180_v25, %v5211_v2  ;;  %v5214_v4 = vld [vmem:[#allocation48_spill] sm:$0xff]  ;;  %v5217_v25 = vld [vmem:[#allocation50_spill] sm:$0xff] }
 0x23d   : > { %1777 = vst.msk [vmem:[%s4155_s15 + $0x1a0] sm:$0xff] %vm1750_vm4, %v1744_v45  ;;  %v1714_v51 = vsel %vm674_vm1, %v1682_v42, %v1520_v56  ;;  %v5212_v45 = vld [vmem:[#allocation71_spill] sm:$0xff]  ;;  %v5213_v42 = vld [vmem:[#allocation45_spill] sm:$0xff] }
 0x23e   : > { %v1747_v60 = vsel %vm1717_vm3, %v1714_v51, %v5195_v52  ;;  %v4548_v5 = vpop.permute.xlu0 %1868  ;;  %2174 = vrot.lane.b32.xlu1 %v5197_v13, %s2958_s10 }
 0x23f   : > { %5196 = vst [vmem:[#allocation54_spill] sm:$0xff] %v4548_v5  ;;  %1780 = vst.msk [vmem:[%s4155_s15 + $0x1c8] sm:$0xff] %vm1750_vm4, %v1747_v60  ;;  %v5216_v60 = vld [vmem:[#allocation49_spill] sm:$0xff] }
 0x240   : > { %v4554_v29 = vpop.permute.xlu1 %1874  ;;  %2172 = vrot.lane.b32.xlu0 %v5199_v28, %s2958_s10  ;;  %v5227_v5 = vld [vmem:[#allocation73_spill] sm:$0xff] }
 0x241   : > { %5198 = vst [vmem:[#allocation95_spill] sm:$0xff] %v4554_v29 }
 0x242   : > { %v1518_v58 = vpop.permute.xlu0 %1517  ;;  %2178 = vrot.lane.b32.xlu1 %v5201_v46, %s2958_s10 }
 0x243   : > { %v1713_v55 = vsel %vm674_vm1, %v1681_v41, %v1518_v58  ;;  %v5218_v58 = vld [vmem:[#allocation51_spill] sm:$0xff] }
 0x244   : > { %v1746_v8 = vsel %vm1717_vm3, %v1713_v55, %v5202_v0  ;;  %v1524_v61 = vpop.permute.xlu1 %1523  ;;  %2176 = vrot.lane.b32.xlu0 %v5204_v20, %s2958_s10  ;;  %v5220_v55 = vld [vmem:[#allocation53_spill] sm:$0xff] }
 0x245   : > { %1779 = vst.msk [vmem:[%s4155_s15 + $0x1c0] sm:$0xff] %vm1750_vm4, %v1746_v8  ;;  %v1716_v31 = vsel %vm674_vm1, %v1684_v32, %v1524_v61 }
 0x246   : > { %v1749_v3 = vsel %vm1717_vm3, %v1716_v31, %v5205_v49  ;;  %v4576_v7 = vpop.permute.xlu0 %1872  ;;  %2182 = vrot.lane.b32.xlu1 %v5207_v14, %s2958_s10 }
 0x247   : > { %5206 = vst [vmem:[#allocation98_spill] sm:$0xff] %v4576_v7  ;;  %1782 = vst.msk [vmem:[%s4155_s15 + $0x1e8] sm:$0xff] %vm1750_vm4, %v1749_v3 }
 0x248   : > { %v4582_v30 = vpop.permute.xlu1 %1878  ;;  %2180 = vrot.lane.b32.xlu0 %v5209_v63, %s2958_s10 }
 0x249   : > { %5208 = vst [vmem:[#allocation13_spill] sm:$0xff] %v4582_v30 }
 0x24a   : > { %2186 = vrot.lane.b32.xlu1 %v5210_v17, %s2958_s10  ;;  %v1522_v39 = vpop.permute.xlu0 %1521 }
 0x24b   : > { %v1715_v22 = vsel %vm674_vm1, %v1683_v23, %v1522_v39 }
 0x24c   : > { %v1748_v56 = vsel %vm1717_vm3, %v1715_v22, %v5212_v45  ;;  %v2043_v33 = vpop.permute.xlu1 %2042  ;;  %2184 = vrot.lane.b32.xlu0 %v5213_v42, %s2958_s10 }
 0x24d   : > { %1781 = vst.msk [vmem:[%s4155_s15 + $0x1e0] sm:$0xff] %vm1750_vm4, %v1748_v56 }
 0x24e   : > { %2190 = vrot.lane.b32.xlu1 %v5214_v4, %s2958_s10  ;;  %v4600_v51 = vpop.permute.xlu0 %1876 }
 0x24f   : > { %5215 = vst [vmem:[#allocation100_spill] sm:$0xff] %v4600_v51  ;;  %v5226_v51 = vld [vmem:[#allocation72_spill] sm:$0xff] }
 0x250   : > { %v2047_v52 = vpop.permute.xlu1 %2046  ;;  %2188 = vrot.lane.b32.xlu0 %v5216_v60, %s2958_s10  ;;  %v2233_v30 = vsel %vm526_vm0, %v4164_v40, %v5226_v51  ;;  %v5230_v51 = vld [vmem:[#allocation76_spill] sm:$0xff] }
 0x251   : > { %v2265_v7 = vsel %vm674_vm1, %v2233_v30, %v2043_v33 }
 0x252   : > { %2194 = vrot.lane.b32.xlu1 %v5217_v25, %s2958_s10  ;;  %v2045_v13 = vpop.permute.xlu0 %2044 }
 0x254   : > { %v2051_v28 = vpop.permute.xlu1 %2050  ;;  %2192 = vrot.lane.b32.xlu0 %v5218_v58, %s2958_s10 }
 0x256   : > { %2198 = vrot.lane.b32.xlu1 %v5219_v34, %s2958_s10  ;;  %v2049_v41 = vpop.permute.xlu0 %2048 }
 0x258   : > { %v2055_v46 = vpop.permute.xlu1 %2054  ;;  %2196 = vrot.lane.b32.xlu0 %v5220_v55, %s2958_s10 }
 0x25a   : > { %v2053_v0 = vpop.permute.xlu0 %2052 }
 0x25c   : > { %v4612_v8 = vpop.permute.xlu1 %2058 }
 0x25e   : > { %v4614_v61 = vpop.permute.xlu0 %2056 }
 0x260   : > { %v4616_v62 = vpop.permute.xlu1 %2062 }
 0x262   : > { %v4618_v32 = vpop.permute.xlu0 %2060 }
 0x264   : > { %v4620_v20 = vpop.permute.xlu1 %2066 }
 0x266   : > { %v4622_v31 = vpop.permute.xlu0 %2064 }
 0x268   : > { %v4624_v49 = vpop.permute.xlu1 %2070 }
 0x26a   : > { %v4626_v3 = vpop.permute.xlu0 %2068 }
 0x26c   : > { %v4628_v14 = vpop.permute.xlu1 %2074 }
 0x26e   : > { %v4630_v63 = vpop.permute.xlu0 %2072 }
 0x270   : > { %v4632_v17 = vpop.permute.xlu1 %2078 }
 0x272   : > { %v4634_v39 = vpop.permute.xlu0 %2076 }
 0x274   : > { %v4636_v2 = vpop.permute.xlu1 %2082 }
 0x276   : > { %v4638_v23 = vpop.permute.xlu0 %2080 }
 0x278   : > { %v4640_v22 = vpop.permute.xlu1 %2086 }
 0x27a   : > { %v4642_v45 = vpop.permute.xlu0 %2084 }
 0x27c   : > { %v4644_v56 = vpop.permute.xlu1 %2090 }
 0x27e   : > { %v4646_v42 = vpop.permute.xlu0 %2088 }
 0x280   : > { %v4648_v4 = vpop.permute.xlu1 %2094 }
 0x282   : > { %v4650_v60 = vpop.permute.xlu0 %2092 }
 0x283   : > { %5221 = vst [vmem:[#allocation55_spill] sm:$0xff] %v4650_v60  ;;  %v2232_v60 = vsel %vm526_vm0, %v4170_v36, %v5227_v5  ;;  %v5229_v5 = vld [vmem:[#allocation75_spill] sm:$0xff] }
 0x284   : > { %v4652_v25 = vpop.permute.xlu1 %2098 }
 0x285   : > { %5222 = vst [vmem:[#allocation16_spill] sm:$0xff] %v4652_v25 }
 0x286   : > { %v4654_v58 = vpop.permute.xlu0 %2096 }
 0x287   : > { %5223 = vst [vmem:[#allocation103_spill] sm:$0xff] %v4654_v58  ;;  %v2264_v58 = vsel %vm674_vm1, %v2232_v60, %v4184_v26  ;;  %v2234_v26 = vsel %vm526_vm0, %v4212_v6, %v5229_v5 }
 0x288   : > { %v4656_v34 = vpop.permute.xlu1 %2102 }
 0x289   : > { %5224 = vst [vmem:[#allocation56_spill] sm:$0xff] %v4656_v34  ;;  %v5228_v34 = vld [vmem:[#allocation74_spill] sm:$0xff] }
 0x28a   : > { %v4658_v55 = vpop.permute.xlu0 %2100  ;;  %v2235_v40 = vsel %vm526_vm0, %v4190_v37, %v5228_v34 }
 0x28b   : > { %5225 = vst [vmem:[#allocation104_spill] sm:$0xff] %v4658_v55  ;;  %v2267_v33 = vsel %vm674_vm1, %v2235_v40, %v2047_v52  ;;  %v2237_v52 = vsel %vm526_vm0, %v4218_v47, %v5230_v51  ;;  %v5232_v40 = vld [vmem:[#allocation78_spill] sm:$0xff]  ;;  %v5235_v51 = vld [vmem:[#allocation81_spill] sm:$0xff] }
 0x28c   : > { %v2139_v29 = vpop.permute.xlu1 %2138 }
 0x28d   : > { %v2297_v25 = vsel %vm1717_vm3, %v2265_v7, %v2139_v29  ;;  %v2266_v7 = vsel %vm674_vm1, %v2234_v26, %v2045_v13 }
 0x28e   : > { %2611 = vst.msk [vmem:[%s4155_s15 + $0x18] sm:$0xff] %vm1750_vm4, %v2297_v25  ;;  %v2137_v55 = vpop.permute.xlu0 %2136  ;;  %v2269_v25 = vsel %vm674_vm1, %v2237_v52, %v2051_v28  ;;  %v2239_v28 = vsel %vm526_vm0, %v4246_v18, %v5232_v40 }
 0x28f   : > { %v2296_v30 = vsel %vm1717_vm3, %v2264_v58, %v2137_v55  ;;  %v5231_v58 = vld [vmem:[#allocation77_spill] sm:$0xff] }
 0x290   : > { %2610 = vst.msk [vmem:[%s4155_s15 + $0x10] sm:$0xff] %vm1750_vm4, %v2296_v30  ;;  %v2143_v36 = vpop.permute.xlu1 %2142  ;;  %v2236_v13 = vsel %vm526_vm0, %v4240_v10, %v5231_v58 }
 0x291   : > { %v2299_v29 = vsel %vm1717_vm3, %v2267_v33, %v2143_v36  ;;  %v2268_v55 = vsel %vm674_vm1, %v2236_v13, %v2049_v41  ;;  %v2271_v33 = vsel %vm674_vm1, %v2239_v28, %v2055_v46  ;;  %v5233_v36 = vld [vmem:[#allocation79_spill] sm:$0xff] }
 0x292   : > { %2613 = vst.msk [vmem:[%s4155_s15 + $0x38] sm:$0xff] %vm1750_vm4, %v2299_v29  ;;  %v2141_v37 = vpop.permute.xlu0 %2140  ;;  %v2238_v41 = vsel %vm526_vm0, %v4268_v38, %v5233_v36  ;;  %v5234_v29 = vld [vmem:[#allocation80_spill] sm:$0xff]  ;;  %v5237_v13 = vld [vmem:[#allocation83_spill] sm:$0xff]  ;;  %v5240_v36 = vld [vmem:[#allocation86_spill] sm:$0xff] }
 0x293   : > { %v2298_v60 = vsel %vm1717_vm3, %v2266_v7, %v2141_v37  ;;  %v2270_v26 = vsel %vm674_vm1, %v2238_v41, %v2053_v0  ;;  %v2241_v46 = vsel %vm526_vm0, %v4274_v59, %v5234_v29  ;;  %v2240_v0 = vsel %vm526_vm0, %v4296_v11, %v5235_v51 }
 0x294   : > { %2612 = vst.msk [vmem:[%s4155_s15 + $0x30] sm:$0xff] %vm1750_vm4, %v2298_v60  ;;  %v2147_v6 = vpop.permute.xlu1 %2146  ;;  %v2273_v37 = vsel %vm674_vm1, %v2241_v46, %v4612_v8  ;;  %v2272_v60 = vsel %vm674_vm1, %v2240_v0, %v4614_v61  ;;  %v2242_v61 = vsel %vm526_vm0, %v4324_v1, %v5237_v13  ;;  %v5242_v46 = vld [vmem:[#allocation88_spill] sm:$0xff] }
 0x295   : > { %v2301_v34 = vsel %vm1717_vm3, %v2269_v25, %v2147_v6  ;;  %v5236_v25 = vld [vmem:[#allocation82_spill] sm:$0xff] }
 0x296   : > { %2615 = vst.msk [vmem:[%s4155_s15 + $0x58] sm:$0xff] %vm1750_vm4, %v2301_v34  ;;  %v2145_v47 = vpop.permute.xlu0 %2144  ;;  %v2243_v8 = vsel %vm526_vm0, %v4302_v48, %v5236_v25  ;;  %v5245_v25 = vld [vmem:[#allocation91_spill] sm:$0xff] }
 0x297   : > { %v2300_v30 = vsel %vm1717_vm3, %v2268_v55, %v2145_v47  ;;  %v2275_v58 = vsel %vm674_vm1, %v2243_v8, %v4616_v62  ;;  %v2274_v55 = vsel %vm674_vm1, %v2242_v61, %v4618_v32  ;;  %v5238_v47 = vld [vmem:[#allocation84_spill] sm:$0xff]  ;;  %v5247_v61 = vld [vmem:[#allocation93_spill] sm:$0xff] }
 0x298   : > { %2614 = vst.msk [vmem:[%s4155_s15 + $0x50] sm:$0xff] %vm1750_vm4, %v2300_v30  ;;  %v2151_v10 = vpop.permute.xlu1 %2150  ;;  %v2245_v62 = vsel %vm526_vm0, %v4330_v21, %v5238_v47  ;;  %v5239_v30 = vld [vmem:[#allocation85_spill] sm:$0xff] }
 0x299   : > { %v2303_v5 = vsel %vm1717_vm3, %v2271_v33, %v2151_v10  ;;  %v2277_v28 = vsel %vm674_vm1, %v2245_v62, %v4620_v20  ;;  %v2244_v32 = vsel %vm526_vm0, %v4352_v9, %v5239_v30  ;;  %v2247_v20 = vsel %vm526_vm0, %v4358_v50, %v5240_v36  ;;  %v5250_v30 = vld [vmem:[#allocation97_spill] sm:$0xff] }
 0x29a   : > { %2617 = vst.msk [vmem:[%s4155_s15 + $0x78] sm:$0xff] %vm1750_vm4, %v2303_v5  ;;  %v2149_v18 = vpop.permute.xlu0 %2148  ;;  %v2276_v10 = vsel %vm674_vm1, %v2244_v32, %v4622_v31  ;;  %v2279_v5 = vsel %vm674_vm1, %v2247_v20, %v4624_v49  ;;  %v2249_v49 = vsel %vm526_vm0, %v4386_v35, %v5242_v46  ;;  %v5252_v20 = vld [vmem:[#allocation101_spill] sm:$0xff] }
 0x29b   : > { %v2302_v7 = vsel %vm1717_vm3, %v2270_v26, %v2149_v18  ;;  %v5241_v26 = vld [vmem:[#allocation87_spill] sm:$0xff] }
 0x29c   : > { %2616 = vst.msk [vmem:[%s4155_s15 + $0x70] sm:$0xff] %vm1750_vm4, %v2302_v7  ;;  %v2155_v38 = vpop.permute.xlu1 %2154  ;;  %v2246_v31 = vsel %vm526_vm0, %v4380_v44, %v5241_v26  ;;  %v5254_v26 = vld [vmem:[#allocation54_spill] sm:$0xff] }
 0x29d   : > { %v2305_v52 = vsel %vm1717_vm3, %v2273_v37, %v2155_v38  ;;  %v2278_v29 = vsel %vm674_vm1, %v2246_v31, %v4626_v3  ;;  %v2281_v37 = vsel %vm674_vm1, %v2249_v49, %v4628_v14  ;;  %v5243_v38 = vld [vmem:[#allocation89_spill] sm:$0xff] }
 0x29e   : > { %2619 = vst.msk [vmem:[%s4155_s15 + $0x98] sm:$0xff] %vm1750_vm4, %v2305_v52  ;;  %v2153_v59 = vpop.permute.xlu0 %2152  ;;  %v2248_v3 = vsel %vm526_vm0, %v4408_v54, %v5243_v38  ;;  %v5244_v52 = vld [vmem:[#allocation90_spill] sm:$0xff] }
 0x29f   : > { %v2304_v6 = vsel %vm1717_vm3, %v2272_v60, %v2153_v59  ;;  %v2280_v0 = vsel %vm674_vm1, %v2248_v3, %v4630_v63  ;;  %v2251_v14 = vsel %vm526_vm0, %v4414_v27, %v5244_v52  ;;  %v2250_v63 = vsel %vm526_vm0, %v4436_v19, %v5245_v25  ;;  %v5259_v38 = vld [vmem:[#allocation106_spill] sm:$0xff] }
 0x2a0   : > { %2618 = vst.msk [vmem:[%s4155_s15 + $0x90] sm:$0xff] %vm1750_vm4, %v2304_v6  ;;  %v2159_v11 = vpop.permute.xlu1 %2158  ;;  %v2283_v59 = vsel %vm674_vm1, %v2251_v14, %v4632_v17  ;;  %v2282_v6 = vsel %vm674_vm1, %v2250_v63, %v4634_v39  ;;  %v2252_v39 = vsel %vm526_vm0, %v4464_v12, %v5247_v61  ;;  %v5260_v3 = vld [vmem:[#allocation98_spill] sm:$0xff]  ;;  %v5264_v63 = vld [vmem:[#allocation56_spill] sm:$0xff] }
 0x2a1   : > { %v2307_v34 = vsel %vm1717_vm3, %v2275_v58, %v2159_v11  ;;  %v5246_v58 = vld [vmem:[#allocation92_spill] sm:$0xff] }
 0x2a2   : > { %2621 = vst.msk [vmem:[%s4155_s15 + $0xb8] sm:$0xff] %vm1750_vm4, %v2307_v34  ;;  %v2157_v48 = vpop.permute.xlu0 %2156  ;;  %v2253_v17 = vsel %vm526_vm0, %v4442_v53, %v5246_v58  ;;  %v5266_v58 = vld [vmem:[#allocation100_spill] sm:$0xff] }
 0x2a3   : > { %v2306_v40 = vsel %vm1717_vm3, %v2274_v55, %v2157_v48  ;;  %v2285_v13 = vsel %vm674_vm1, %v2253_v17, %v4636_v2  ;;  %v2284_v55 = vsel %vm674_vm1, %v2252_v39, %v4638_v23  ;;  %v5248_v48 = vld [vmem:[#allocation94_spill] sm:$0xff] }
 0x2a4   : > { %2620 = vst.msk [vmem:[%s4155_s15 + $0xb0] sm:$0xff] %vm1750_vm4, %v2306_v40  ;;  %v2163_v1 = vpop.permute.xlu1 %2162  ;;  %v2255_v2 = vsel %vm526_vm0, %v4470_v15, %v5248_v48  ;;  %v5249_v40 = vld [vmem:[#allocation96_spill] sm:$0xff] }
 0x2a5   : > { %v2309_v33 = vsel %vm1717_vm3, %v2277_v28, %v2163_v1  ;;  %v2287_v62 = vsel %vm674_vm1, %v2255_v2, %v4640_v22  ;;  %v2254_v23 = vsel %vm526_vm0, %v4492_v24, %v5249_v40  ;;  %v2257_v22 = vsel %vm526_vm0, %v4498_v43, %v5250_v30 }
 0x2a6   : > { %2623 = vst.msk [vmem:[%s4155_s15 + $0xd8] sm:$0xff] %vm1750_vm4, %v2309_v33  ;;  %v2161_v21 = vpop.permute.xlu0 %2160  ;;  %v2286_v1 = vsel %vm674_vm1, %v2254_v23, %v4642_v45  ;;  %v2289_v33 = vsel %vm674_vm1, %v2257_v22, %v4644_v56  ;;  %v2259_v56 = vsel %vm526_vm0, %v4526_v16, %v5252_v20 }
 0x2a7   : > { %v2308_v41 = vsel %vm1717_vm3, %v2276_v10, %v2161_v21  ;;  %v5251_v10 = vld [vmem:[#allocation99_spill] sm:$0xff] }
 0x2a8   : > { %2622 = vst.msk [vmem:[%s4155_s15 + $0xd0] sm:$0xff] %vm1750_vm4, %v2308_v41  ;;  %v2167_v9 = vpop.permute.xlu1 %2166  ;;  %v2256_v45 = vsel %vm526_vm0, %v4520_v57, %v5251_v10 }
 0x2a9   : > { %v2311_v18 = vsel %vm1717_vm3, %v2279_v5, %v2167_v9  ;;  %v2288_v36 = vsel %vm674_vm1, %v2256_v45, %v4646_v42  ;;  %v2291_v5 = vsel %vm674_vm1, %v2259_v56, %v4648_v4  ;;  %v5253_v9 = vld [vmem:[#allocation102_spill] sm:$0xff]  ;;  %v5257_v4 = vld [vmem:[#allocation95_spill] sm:$0xff] }
 0x2aa   : > { %2625 = vst.msk [vmem:[%s4155_s15 + $0xf8] sm:$0xff] %vm1750_vm4, %v2311_v18  ;;  %v2165_v50 = vpop.permute.xlu0 %2164  ;;  %v2258_v42 = vsel %vm526_vm0, %v5254_v26, %v5253_v9  ;;  %v5255_v18 = vld [vmem:[#allocation55_spill] sm:$0xff] }
 0x2ab   : > { %v2310_v7 = vsel %vm1717_vm3, %v2278_v29, %v2165_v50  ;;  %v2290_v29 = vsel %vm674_vm1, %v2258_v42, %v5255_v18  ;;  %v5256_v50 = vld [vmem:[#allocation105_spill] sm:$0xff] }
 0x2ac   : > { %2624 = vst.msk [vmem:[%s4155_s15 + $0xf0] sm:$0xff] %vm1750_vm4, %v2310_v7  ;;  %v2171_v44 = vpop.permute.xlu1 %2170  ;;  %v2261_v46 = vsel %vm526_vm0, %v5257_v4, %v5256_v50  ;;  %v5258_v7 = vld [vmem:[#allocation16_spill] sm:$0xff] }
 0x2ad   : > { %v2313_v51 = vsel %vm1717_vm3, %v2281_v37, %v2171_v44  ;;  %v2293_v37 = vsel %vm674_vm1, %v2261_v46, %v5258_v7 }
 0x2ae   : > { %2627 = vst.msk [vmem:[%s4155_s15 + $0x118] sm:$0xff] %vm1750_vm4, %v2313_v51  ;;  %v2169_v35 = vpop.permute.xlu0 %2168  ;;  %v2260_v51 = vsel %vm526_vm0, %v5260_v3, %v5259_v38 }
 0x2af   : > { %v2312_v60 = vsel %vm1717_vm3, %v2280_v0, %v2169_v35  ;;  %v5261_v35 = vld [vmem:[#allocation103_spill] sm:$0xff] }
 0x2b0   : > { %2626 = vst.msk [vmem:[%s4155_s15 + $0x110] sm:$0xff] %vm1750_vm4, %v2312_v60  ;;  %v2175_v54 = vpop.permute.xlu1 %2174  ;;  %v2292_v52 = vsel %vm674_vm1, %v2260_v51, %v5261_v35  ;;  %v5262_v60 = vld [vmem:[#allocation107_spill] sm:$0xff] }
 0x2b1   : > { %v2315_v8 = vsel %vm1717_vm3, %v2283_v59, %v2175_v54  ;;  %v5263_v59 = vld [vmem:[#allocation13_spill] sm:$0xff] }
 0x2b2   : > { %2629 = vst.msk [vmem:[%s4155_s15 + $0x138] sm:$0xff] %vm1750_vm4, %v2315_v8  ;;  %v2173_v27 = vpop.permute.xlu0 %2172  ;;  %v2263_v54 = vsel %vm526_vm0, %v5263_v59, %v5262_v60 }
 0x2b3   : > { %v2314_v11 = vsel %vm1717_vm3, %v2282_v6, %v2173_v27  ;;  %v2295_v8 = vsel %vm674_vm1, %v2263_v54, %v5264_v63  ;;  %v5265_v27 = vld [vmem:[#allocation108_spill] sm:$0xff] }
 0x2b4   : > { %2628 = vst.msk [vmem:[%s4155_s15 + $0x130] sm:$0xff] %vm1750_vm4, %v2314_v11  ;;  %v2179_v19 = vpop.permute.xlu1 %2178  ;;  %v2262_v17 = vsel %vm526_vm0, %v5266_v58, %v5265_v27 }
 0x2b5   : > { %v2317_v34 = vsel %vm1717_vm3, %v2285_v13, %v2179_v19  ;;  %v5267_v13 = vld [vmem:[#allocation104_spill] sm:$0xff] }
 0x2b6   : > { %2631 = vst.msk [vmem:[%s4155_s15 + $0x158] sm:$0xff] %vm1750_vm4, %v2317_v34  ;;  %v2177_v53 = vpop.permute.xlu0 %2176  ;;  %v2294_v19 = vsel %vm674_vm1, %v2262_v17, %v5267_v13 }
 0x2b7   : > { %v2316_v47 = vsel %vm1717_vm3, %v2284_v55, %v2177_v53 }
 0x2b8   : > { %2630 = vst.msk [vmem:[%s4155_s15 + $0x150] sm:$0xff] %vm1750_vm4, %v2316_v47  ;;  %v2183_v12 = vpop.permute.xlu1 %2182 }
 0x2b9   : > { %v2319_v28 = vsel %vm1717_vm3, %v2287_v62, %v2183_v12 }
 0x2ba   : > { %2633 = vst.msk [vmem:[%s4155_s15 + $0x178] sm:$0xff] %vm1750_vm4, %v2319_v28  ;;  %v2181_v15 = vpop.permute.xlu0 %2180 }
 0x2bb   : > { %v2318_v32 = vsel %vm1717_vm3, %v2286_v1, %v2181_v15 }
 0x2bc   : > { %2632 = vst.msk [vmem:[%s4155_s15 + $0x170] sm:$0xff] %vm1750_vm4, %v2318_v32  ;;  %v2187_v24 = vpop.permute.xlu1 %2186 }
 0x2bd   : > { %v2321_v21 = vsel %vm1717_vm3, %v2289_v33, %v2187_v24 }
 0x2be   : > { %2635 = vst.msk [vmem:[%s4155_s15 + $0x198] sm:$0xff] %vm1750_vm4, %v2321_v21  ;;  %v2185_v43 = vpop.permute.xlu0 %2184 }
 0x2bf   : > { %v2320_v41 = vsel %vm1717_vm3, %v2288_v36, %v2185_v43 }
 0x2c0   : > { %2634 = vst.msk [vmem:[%s4155_s15 + $0x190] sm:$0xff] %vm1750_vm4, %v2320_v41  ;;  %v2191_v57 = vpop.permute.xlu1 %2190 }
 0x2c1   : > { %v2323_v31 = vsel %vm1717_vm3, %v2291_v5, %v2191_v57 }
 0x2c2   : > { %2637 = vst.msk [vmem:[%s4155_s15 + $0x1b8] sm:$0xff] %vm1750_vm4, %v2323_v31  ;;  %v2189_v16 = vpop.permute.xlu0 %2188 }
 0x2c3   : > { %v2322_v49 = vsel %vm1717_vm3, %v2290_v29, %v2189_v16 }
 0x2c4   : > { %2636 = vst.msk [vmem:[%s4155_s15 + $0x1b0] sm:$0xff] %vm1750_vm4, %v2322_v49  ;;  %v2195_v44 = vpop.permute.xlu1 %2194 }
 0x2c5   : > { %v2325_v0 = vsel %vm1717_vm3, %v2293_v37, %v2195_v44 }
 0x2c6   : > { %2639 = vst.msk [vmem:[%s4155_s15 + $0x1d8] sm:$0xff] %vm1750_vm4, %v2325_v0  ;;  %v2193_v14 = vpop.permute.xlu0 %2192 }
 0x2c7   : > { %v2324_v25 = vsel %vm1717_vm3, %v2292_v52, %v2193_v14 }
 0x2c8   : > { %2638 = vst.msk [vmem:[%s4155_s15 + $0x1d0] sm:$0xff] %vm1750_vm4, %v2324_v25  ;;  %v2199_v6 = vpop.permute.xlu1 %2198 }
 0x2c9   : > { %v2327_v11 = vsel %vm1717_vm3, %v2295_v8, %v2199_v6 }
 0x2ca   : > { %2641 = vst.msk [vmem:[%s4155_s15 + $0x1f8] sm:$0xff] %vm1750_vm4, %v2327_v11  ;;  %v2197_v61 = vpop.permute.xlu0 %2196 }
 0x2cb   : > { %v2326_v39 = vsel %vm1717_vm3, %v2294_v19, %v2197_v61 }
 0x2cc   : > { %2640 = vst.msk [vmem:[%s4155_s15 + $0x1f0] sm:$0xff] %vm1750_vm4, %v2326_v39 }
 0x2cd   : > { %2892 = shalt.err (!%p2889_p5)
}
 0x2ce   : > { %s2893_s11 = scalar_lea.hbm %s4907_s25, 8192  ;;  %s2897_s14 = scalar_lea.hbm %s4971_s5, 16384 }
 0x2cf   : > { %p2894_p6 = scmp.ne.s32.totalorder %s4907_s25, %s2893_s11  ;;  %p2898_p10 = scmp.lt.s32.totalorder %s4907_s25, %s4971_s5 }
 0x2d0   : > { %p2899_p11 = scmp.lt.s32.totalorder %s2897_s14, %s2893_s11 }
 0x2d1   : > { %p2895_p7 = pnand %p2894_p6, %p3033_p4 }
 0x2d2   : > { %p2900_p12 = por %p2899_p11, %p2898_p10 }
 0x2d3   : > { %p2896_p9 = pneg %p2895_p7 }
 0x2d5   : > { %p2901_p13 = pnand %p2900_p12, %p2896_p9 }
 0x2d7   : > { %2904 = shalt.err (!%p2901_p13)
}
 0x2d8   : > { %s2962_s21 = smov 128  }
 0x2d9   : > { %2819 = dma.vmem_to_hbm [thread:$0]  (%p3033_p4), %s4913_s17, 8192, %s4907_s25, %s4920_s27, %s2962_s21, %s2962_s21, %s2958_s10  }
 0x2da PF: > { %p2825_p0 = scmp.ge.s32.totalorder %s2955_s23, 2  ;;  %s2393_s24 = sand.u32 1, %s2935_s18  }
 0x2db   : > { %s2394_s29 = scalar_lea.sflag [#allocation3], %s2393_s24 }
 0x2dc   : > { %p2822_p1 = pnand %p2825_p0, %p3040_p8 }
 0x2de   : > { %p2823_p2 = pneg %p2822_p1 }
 0x2e0   : > { %2930 = dma.done.wait (%p2823_p2), %s2394_s29, 8192  }
 0x2e1   : > { %2932 = vsyncadd (%p2823_p2), %s2394_s29, 4294959104  ;;  %s18_s23 = sadd.s32 1, %s2955_s23   ;;  %s5268_s18 = smov %s2939_s19 }
 0x2e2   : > { %p15_p3 = scmp.ge.s32.totalorder %s18_s23, 4   ;;  %s5269_s19 = smov %s2943_s20 }
 0x2e3   : > { %s5270_s20 = smov %s3046_s6  ;;  %s5271_s21 = smov %s2951_s22 }
 0x2e4   : > { %s5272_s22 = smov %s5274_s26  ;;  %17 = sbr.rel (!%p15_p3) target bundleno = 4 (0x4), region = 83 }
 0x2e9   :  { %2399 = vsyncpa [#allocation3], 1 }
 0x2ea   :  { %2401 = vsyncpa [#allocation3 + $0x1], 1 }

</bundles_post_ra>
